<compile_context>
chip_gen: v5e
topology: v5e:2x2
jax: 0.10.0
libtpu: 0.0.40
codegen_flags: <defaults>
</compile_context>

<pallas_src>
import functools

import jax
import jax.numpy as jnp
from jax.experimental import pallas as pl
from jax.experimental.pallas import tpu as pltpu


# ----------------------------------------------------------------------------
# Glue: constant operator matrices (built once, outside the kernel)
# ----------------------------------------------------------------------------
def _round_up(a: int, m: int) -> int:
    return ((a + m - 1) // m) * m


def _box_band_matrix(n: int, r: int, dtype=jnp.float32):
    """Banded matrix B (n, n): B[i, j] = 1/(2r+1) if |i-j| <= r else 0.

    Z @ B == 1-D zero-padded box filter of the rows of Z (PyTorch conv2d
    padding=r semantics); B is symmetric so B @ Z filters columns.
    """
    k = 2 * r + 1
    idx = jnp.arange(n)
    band = (jnp.abs(idx[:, None] - idx[None, :]) <= r).astype(dtype)
    return band / jnp.asarray(k, dtype)


def _bilinear_matrix(out_size: int, in_size: int, dtype=jnp.float32):
    """U (out, in): U @ z == 1-D bilinear resize, align_corners=False."""
    ratio = in_size / out_size
    dst = jnp.arange(out_size, dtype=jnp.float32)
    src = ratio * (dst + 0.5) - 0.5
    src = jnp.maximum(src, 0.0)
    i0f = jnp.floor(src)
    lam1 = src - i0f
    lam0 = 1.0 - lam1
    i0 = jnp.minimum(i0f.astype(jnp.int32), in_size - 1)
    i1 = jnp.minimum(i0 + 1, in_size - 1)
    oh0 = jax.nn.one_hot(i0, in_size, dtype=dtype)
    oh1 = jax.nn.one_hot(i1, in_size, dtype=dtype)
    return lam0[:, None] * oh0 + lam1[:, None] * oh1


# ----------------------------------------------------------------------------
# Pallas kernel
# ----------------------------------------------------------------------------
def _fgf_kernel(lrx_ref, lry_ref, hrx_ref, bh_ref, bw_ref, uxt_ref, uy_ref,
                out_ref, abw_ref, *, eps: float, h: int, w: int, wp: int):
    j = pl.program_id(1)

    # ---- Phase 1 (once per (n, c) slice): low-res stats + width upsample ----
    @pl.when(j == 0)
    def _():
        x = lrx_ref[0].astype(jnp.float32)          # (h, w)
        y = lry_ref[0].astype(jnp.float32)          # (h, w)
        bh = bh_ref[...]                            # (h, h) f32
        bw = bw_ref[...]                            # (w, w) f32

        # Fused box filter: 8 small matmuls -> 2 larger ones.
        s = jnp.concatenate([x, y, x * y, x * x], axis=1)           # (h, 4w)
        p = jnp.dot(bh, s, preferred_element_type=jnp.float32)      # height
        q = jnp.concatenate(
            [p[:, 0:w], p[:, w:2 * w], p[:, 2 * w:3 * w], p[:, 3 * w:4 * w]],
            axis=0)                                                 # (4h, w)
        m = jnp.dot(q, bw, preferred_element_type=jnp.float32)      # width

        mean_x = m[0:h]
        mean_y = m[h:2 * h]
        mean_xy = m[2 * h:3 * h]
        mean_xx = m[3 * h:4 * h]

        cov_xy = mean_xy - mean_x * mean_y          # f32 elementwise path
        var_x = mean_xx - mean_x * mean_x
        A = cov_xy / (var_x + eps)
        b = mean_y - A * mean_x

        # Width-direction bilinear upsample of [A; b] (bf16 MXU operands),
        # cached in VMEM scratch for all H-tiles of this slice.
        ab = jnp.concatenate([A, b], axis=0).astype(uxt_ref.dtype)  # (2h, w)
        abw = jnp.dot(ab, uxt_ref[...],
                      preferred_element_type=jnp.float32)           # (2h, wp)
        abw_ref[:, 0:wp] = abw[0:h].astype(abw_ref.dtype)
        abw_ref[:, wp:2 * wp] = abw[h:2 * h].astype(abw_ref.dtype)

    # ---- Phase 2 (every high-res row tile): height upsample + final FMA ----
    t = jnp.dot(uy_ref[...], abw_ref[...],
                preferred_element_type=jnp.float32)                 # (TH, 2wp)
    a_hr = t[:, 0:wp]
    b_hr = t[:, wp:2 * wp]
    hr = hrx_ref[0].astype(jnp.float32)
    out_ref[0] = (a_hr * hr + b_hr).astype(out_ref.dtype)


# ----------------------------------------------------------------------------
# FastGuidedFilter wrapper
# ----------------------------------------------------------------------------
def fast_guided_filter(lr_x, lr_y, hr_x, *, r: int, eps: float = 1e-5,
                       tile_h: int = 128, mxu_dtype=jnp.bfloat16):
    """Pallas implementation of FastGuidedFilter.forward (NCHW)."""
    N, C, h, w = lr_x.shape
    Nh, Ch, H, W = hr_x.shape
    assert (N, C) == (Nh, Ch), "batch/channel mismatch"
    assert lr_y.shape == lr_x.shape

    NC = N * C
    out_dtype = hr_x.dtype

    Wp = _round_up(W, 128)                  # lane-dense output width
    TH = min(int(tile_h), _round_up(H, 8))  # high-res row tile
    Hp = _round_up(H, TH)
    J = Hp // TH

    lrx_f = lr_x.reshape(NC, h, w).astype(jnp.float32)
    lry_f = lr_y.reshape(NC, h, w).astype(jnp.float32)
    hrx_f = jnp.pad(hr_x.reshape(NC, H, W), ((0, 0), (0, Hp - H), (0, Wp - W)))

    bh = _box_band_matrix(h, r)                                   # (h, h) f32
    bw = _box_band_matrix(w, r)                                   # (w, w) f32
    uy = jnp.pad(_bilinear_matrix(H, h).astype(mxu_dtype),
                 ((0, Hp - H), (0, 0)))                           # (Hp, h)
    uxt = jnp.pad(_bilinear_matrix(W, w).T.astype(mxu_dtype),
                  ((0, 0), (0, Wp - W)))                          # (w, Wp)

    kernel = functools.partial(_fgf_kernel, eps=float(eps),
                               h=int(h), w=int(w), wp=int(Wp))

    flops = int(NC * (8 * h * w * (h + w)         # fused box matmuls
                      + 4 * h * w * Wp            # width upsample of [A;b]
                      + 4 * Hp * h * Wp           # per-tile height upsample
                      + 12 * h * w + 2 * Hp * Wp))
    bytes_accessed = int(4 * NC * (2 * h * w + 2 * Hp * Wp)
                         + 4 * (h * h + w * w) + 2 * (Hp * h + w * Wp))
    cost = pl.CostEstimate(flops=flops, transcendentals=0,
                           bytes_accessed=bytes_accessed)

    def run(single_buffer_consts: bool):
        if single_buffer_consts:
            def const_spec(shape, imap):
                # Constant index_map -> no re-DMA; single buffer saves VMEM.
                return pl.BlockSpec(shape, imap, pipeline_mode=pl.Buffered(1))
        else:
            def const_spec(shape, imap):
                return pl.BlockSpec(shape, imap)

        grid_spec = pltpu.PrefetchScalarGridSpec(
            num_scalar_prefetch=0,
            grid=(NC, J),
            in_specs=[
                pl.BlockSpec((1, h, w), lambda i, j: (i, 0, 0)),    # lr_x
                pl.BlockSpec((1, h, w), lambda i, j: (i, 0, 0)),    # lr_y
                pl.BlockSpec((1, TH, Wp), lambda i, j: (i, j, 0)),  # hr_x tile
                const_spec((h, h), lambda i, j: (0, 0)),            # Bh
                const_spec((w, w), lambda i, j: (0, 0)),            # Bw
                const_spec((w, Wp), lambda i, j: (0, 0)),           # Ux^T
                pl.BlockSpec((TH, h), lambda i, j: (j, 0)),         # Uy tile
            ],
            out_specs=pl.BlockSpec((1, TH, Wp), lambda i, j: (i, j, 0)),
            scratch_shapes=[pltpu.VMEM((h, 2 * Wp), mxu_dtype)],    # [A_w | b_w]
        )
        out = pl.pallas_call(
            kernel,
            out_shape=jax.ShapeDtypeStruct((NC, Hp, Wp), out_dtype),
            grid_spec=grid_spec,
            compiler_params=pltpu.CompilerParams(
                dimension_semantics=("parallel", "arbitrary"),
                vmem_limit_bytes=48 * 1024 * 1024),
            cost_estimate=cost,
        )(lrx_f, lry_f, hrx_f, bh, bw, uxt, uy)
        return jax.block_until_ready(out)

    try:
        out_f = run(True)
    except Exception:
        # pl.Buffered(1) not supported on this jax build -> default buffering.
        out_f = run(False)

    return out_f[:, :H, :W].reshape(N, C, H, W)


# ----------------------------------------------------------------------------
# FastGuidedFilterRefiner wrapper (gray-mean / concat / split are thin glue)
# ----------------------------------------------------------------------------
def fast_guided_filter_refiner(fine_src, base_src, base_fgr, base_pha,
                               base_hid=None, *, r: int = 1, eps: float = 1e-5):
    del base_hid  # unused by the reference module as well
    if fine_src.ndim == 5:                       # (B, T, C, H, W) time series
        B, T = fine_src.shape[:2]
        fgr, pha = fast_guided_filter_refiner(
            fine_src.reshape((B * T,) + fine_src.shape[2:]),
            base_src.reshape((B * T,) + base_src.shape[2:]),
            base_fgr.reshape((B * T,) + base_fgr.shape[2:]),
            base_pha.reshape((B * T,) + base_pha.shape[2:]),
            r=r, eps=eps)
        return (fgr.reshape((B, T) + fgr.shape[1:]),
                pha.reshape((B, T) + pha.shape[1:]))

    fine_gray = jnp.mean(fine_src, axis=1, keepdims=True)
    base_gray = jnp.mean(base_src, axis=1, keepdims=True)
    lr_x = jnp.concatenate([base_src, base_gray], axis=1)
    lr_y = jnp.concatenate([base_fgr, base_pha], axis=1)
    hr_x = jnp.concatenate([fine_src, fine_gray], axis=1)
    out = fast_guided_filter(lr_x, lr_y, hr_x, r=r, eps=eps)
    return out[:, :3], out[:, 3:]


# ----------------------------------------------------------------------------
# Pure-JAX references (sanity check only)
# ----------------------------------------------------------------------------
def _guided_filter_reference(lr_x, lr_y, hr_x, *, r, eps, match_kernel_bf16=False):
    _, _, h, w = lr_x.shape
    _, _, H, W = hr_x.shape
    bh = _box_band_matrix(h, r)
    bw = _box_band_matrix(w, r)
    uy = _bilinear_matrix(H, h)
    ux = _bilinear_matrix(W, w)

    lr_x = lr_x.astype(jnp.float32)
    lr_y = lr_y.astype(jnp.float32)
    hr_x = hr_x.astype(jnp.float32)

    def box(z):
        return jnp.einsum('ij,ncjk,kl->ncil', bh, z, bw)

    mean_x = box(lr_x)
    mean_y = box(lr_y)
    cov_xy = box(lr_x * lr_y) - mean_x * mean_y
    var_x = box(lr_x * lr_x) - mean_x * mean_x
    A = cov_xy / (var_x + eps)
    b = mean_y - A * mean_x

    if match_kernel_bf16:
        uy_b = uy.astype(jnp.bfloat16)
        uxt_b = ux.T.astype(jnp.bfloat16)

        def up(z):
            zw = jnp.einsum('nchw,wW->nchW', z.astype(jnp.bfloat16), uxt_b,
                            preferred_element_type=jnp.float32)
            zw = zw.astype(jnp.bfloat16)
            return jnp.einsum('Hh,nchW->ncHW', uy_b, zw,
                              preferred_element_type=jnp.float32)
    else:
        def up(z):
            return jnp.einsum('Hh,nchw,Ww->ncHW', uy, z, ux)

    return up(A) * hr_x + up(b)


def _refiner_reference(fine_src, base_src, base_fgr, base_pha, *,
                       r=1, eps=1e-5, match_kernel_bf16=False):
    fine_gray = jnp.mean(fine_src, axis=1, keepdims=True)
    base_gray = jnp.mean(base_src, axis=1, keepdims=True)
    lr_x = jnp.concatenate([base_src, base_gray], axis=1)
    lr_y = jnp.concatenate([base_fgr, base_pha], axis=1)
    hr_x = jnp.concatenate([fine_src, fine_gray], axis=1)
    out = _guided_filter_reference(lr_x, lr_y, hr_x, r=r, eps=eps,
                                   match_kernel_bf16=match_kernel_bf16)
    return out[:, :3], out[:, 3:]


# ----------------------------------------------------------------------------
if __name__ == "__main__":
    key = jax.random.PRNGKey(0)
    k1, k2, k3, k4 = jax.random.split(key, 4)

    B = 2
    h = w = 16     # low-res spatial
    H = W = 32     # high-res spatial

    fine_src = jax.random.uniform(k1, (B, 3, H, W), dtype=jnp.float32)
    base_src = jax.random.uniform(k2, (B, 3, h, w), dtype=jnp.float32)
    base_fgr = jax.random.uniform(k3, (B, 3, h, w), dtype=jnp.float32)
    base_pha = jax.random.uniform(k4, (B, 1, h, w), dtype=jnp.float32)

    fgr, pha = fast_guided_filter_refiner(fine_src, base_src, base_fgr,
                                          base_pha, None)
    fgr = jax.block_until_ready(fgr)
    pha = jax.block_until_ready(pha)
    assert fgr.shape == (B, 3, H, W)
    assert pha.shape == (B, 1, H, W)
    out = jnp.concatenate([fgr, pha], axis=1)

    # Tight check vs a reference that mirrors the kernel's bf16 upsample path.
    ref_fgr_m, ref_pha_m = _refiner_reference(fine_src, base_src, base_fgr,
                                              base_pha, match_kernel_bf16=True)
    ref_m = jnp.concatenate([ref_fgr_m, ref_pha_m], axis=1)
    err_m = float(jnp.max(jnp.abs(out - ref_m)))
    scale_m = float(jnp.max(jnp.abs(ref_m)))
    assert err_m <= 5e-3 * (1.0 + scale_m), f"bf16-matched mismatch: {err_m}"

    # Loose check vs the full-f32 reference (module semantics).
    ref_fgr, ref_pha = _refiner_reference(fine_src, base_src, base_fgr,
                                          base_pha, match_kernel_bf16=False)
    ref_f = jnp.concatenate([ref_fgr, ref_pha], axis=1)
    err_f = float(jnp.max(jnp.abs(out - ref_f)))
    scale_f = float(jnp.max(jnp.abs(ref_f)))
    assert err_f <= 5e-2 * (1.0 + scale_f), f"f32 reference mismatch: {err_f}"

    print("KERNEL_OK")
</pallas_src>

<mosaic_0001>
module attributes {stable_mosaic.version = 11 : i64} {
  func.func @_fgf_kernel(%arg0: i32, %arg1: i32, %arg2: memref<1x16x16xf32, #tpu.memory_space<vmem>>, %arg3: memref<1x16x16xf32, #tpu.memory_space<vmem>>, %arg4: memref<1x32x128xf32, #tpu.memory_space<vmem>>, %arg5: memref<16x16xf32, #tpu.memory_space<vmem>>, %arg6: memref<16x16xf32, #tpu.memory_space<vmem>>, %arg7: memref<16x128xbf16, #tpu.memory_space<vmem>>, %arg8: memref<32x16xbf16, #tpu.memory_space<vmem>>, %arg9: memref<1x32x128xf32, #tpu.memory_space<vmem>>, %arg10: memref<16x256xbf16, #tpu.memory_space<vmem>>) attributes {dimension_semantics = [#tpu.dimension_semantics<parallel>, #tpu.dimension_semantics<arbitrary>], iteration_bounds = array<i64: 8, 1>, scalar_prefetch = 0 : i64, scratch_operands = 1 : i64, tpu.core_type = #tpu.core_type<tc>, window_params = [{transform_indices = @transform_0, window_bounds = array<i64: 1, 16, 16>}, {transform_indices = @transform_1, window_bounds = array<i64: 1, 16, 16>}, {transform_indices = @transform_2, window_bounds = array<i64: 1, 32, 128>}, {pipeline_mode = #tpu.pipeline_mode<synchronous>, transform_indices = @transform_3, window_bounds = array<i64: 16, 16>}, {pipeline_mode = #tpu.pipeline_mode<synchronous>, transform_indices = @transform_4, window_bounds = array<i64: 16, 16>}, {pipeline_mode = #tpu.pipeline_mode<synchronous>, transform_indices = @transform_5, window_bounds = array<i64: 16, 128>}, {transform_indices = @transform_6, window_bounds = array<i64: 32, 16>}, {transform_indices = @transform_7, window_bounds = array<i64: 1, 32, 128>}]} {
    %c0_i32 = arith.constant 0 : i32
    %0 = arith.cmpi eq, %arg1, %c0_i32 : i32
    %1 = arith.extui %0 : i1 to i32
    %c0_i32_0 = arith.constant 0 : i32
    %2 = arith.cmpi ne, %1, %c0_i32_0 : i32
    scf.if %2 {
      %c0_10 = arith.constant 0 : index
      %c0_11 = arith.constant 0 : index
      %c0_12 = arith.constant 0 : index
      %15 = vector.load %arg2[%c0_10, %c0_11, %c0_12] : memref<1x16x16xf32, #tpu.memory_space<vmem>>, vector<1x16x16xf32>
      %16 = vector.shape_cast %15 : vector<1x16x16xf32> to vector<16x16xf32>
      %c0_13 = arith.constant 0 : index
      %c0_14 = arith.constant 0 : index
      %c0_15 = arith.constant 0 : index
      %17 = vector.load %arg3[%c0_13, %c0_14, %c0_15] : memref<1x16x16xf32, #tpu.memory_space<vmem>>, vector<1x16x16xf32>
      %18 = vector.shape_cast %17 : vector<1x16x16xf32> to vector<16x16xf32>
      %c0_16 = arith.constant 0 : index
      %c0_17 = arith.constant 0 : index
      %19 = vector.load %arg5[%c0_16, %c0_17] : memref<16x16xf32, #tpu.memory_space<vmem>>, vector<16x16xf32>
      %c0_18 = arith.constant 0 : index
      %c0_19 = arith.constant 0 : index
      %20 = vector.load %arg6[%c0_18, %c0_19] : memref<16x16xf32, #tpu.memory_space<vmem>>, vector<16x16xf32>
      %21 = arith.mulf %16, %18 : vector<16x16xf32>
      %22 = arith.mulf %16, %16 : vector<16x16xf32>
      %23 = tpu.concatenate %16, %18, %21, %22 in 1 : vector<16x16xf32>, vector<16x16xf32>, vector<16x16xf32>, vector<16x16xf32> -> vector<16x64xf32>
      %cst_20 = arith.constant dense<0.000000e+00> : vector<16x64xf32>
      %24 = tpu.matmul %19, %23, %cst_20 {dimension_numbers = #tpu.dot_dimension_numbers<[1], [0], [0], [1], [0, 0, 1, 1], [], []>} : vector<16x16xf32>, vector<16x64xf32>, vector<16x64xf32> -> vector<16x64xf32>
      %25 = vector.extract_strided_slice %24 {offsets = [0, 0], sizes = [16, 16], strides = [1, 1]} : vector<16x64xf32> to vector<16x16xf32>
      %26 = vector.extract_strided_slice %24 {offsets = [0, 16], sizes = [16, 16], strides = [1, 1]} : vector<16x64xf32> to vector<16x16xf32>
      %27 = vector.extract_strided_slice %24 {offsets = [0, 32], sizes = [16, 16], strides = [1, 1]} : vector<16x64xf32> to vector<16x16xf32>
      %28 = vector.extract_strided_slice %24 {offsets = [0, 48], sizes = [16, 16], strides = [1, 1]} : vector<16x64xf32> to vector<16x16xf32>
      %29 = tpu.concatenate %25, %26, %27, %28 in 0 : vector<16x16xf32>, vector<16x16xf32>, vector<16x16xf32>, vector<16x16xf32> -> vector<64x16xf32>
      %cst_21 = arith.constant dense<0.000000e+00> : vector<64x16xf32>
      %30 = tpu.matmul %29, %20, %cst_21 {dimension_numbers = #tpu.dot_dimension_numbers<[1], [0], [0], [1], [0, 0, 1, 1], [], []>} : vector<64x16xf32>, vector<16x16xf32>, vector<64x16xf32> -> vector<64x16xf32>
      %31 = vector.extract_strided_slice %30 {offsets = [0, 0], sizes = [16, 16], strides = [1, 1]} : vector<64x16xf32> to vector<16x16xf32>
      %32 = vector.extract_strided_slice %30 {offsets = [16, 0], sizes = [16, 16], strides = [1, 1]} : vector<64x16xf32> to vector<16x16xf32>
      %33 = vector.extract_strided_slice %30 {offsets = [32, 0], sizes = [16, 16], strides = [1, 1]} : vector<64x16xf32> to vector<16x16xf32>
      %34 = vector.extract_strided_slice %30 {offsets = [48, 0], sizes = [16, 16], strides = [1, 1]} : vector<64x16xf32> to vector<16x16xf32>
      %35 = arith.mulf %31, %32 : vector<16x16xf32>
      %36 = arith.subf %33, %35 : vector<16x16xf32>
      %37 = arith.mulf %31, %31 : vector<16x16xf32>
      %38 = arith.subf %34, %37 : vector<16x16xf32>
      %cst_22 = arith.constant 9.99999974E-6 : f32
      %39 = vector.broadcast %cst_22 : f32 to vector<16x16xf32>
      %40 = arith.addf %38, %39 : vector<16x16xf32>
      %41 = arith.divf %36, %40 : vector<16x16xf32>
      %42 = arith.mulf %41, %31 : vector<16x16xf32>
      %43 = arith.subf %32, %42 : vector<16x16xf32>
      %44 = tpu.concatenate %41, %43 in 0 : vector<16x16xf32>, vector<16x16xf32> -> vector<32x16xf32>
      %45 = arith.truncf %44 : vector<32x16xf32> to vector<32x16xbf16>
      %c0_23 = arith.constant 0 : index
      %c0_24 = arith.constant 0 : index
      %46 = vector.load %arg7[%c0_23, %c0_24] : memref<16x128xbf16, #tpu.memory_space<vmem>>, vector<16x128xbf16>
      %cst_25 = arith.constant dense<0.000000e+00> : vector<32x128xf32>
      %47 = tpu.matmul %45, %46, %cst_25 {dimension_numbers = #tpu.dot_dimension_numbers<[1], [0], [0], [1], [0, 0, 1, 1], [], []>} : vector<32x16xbf16>, vector<16x128xbf16>, vector<32x128xf32> -> vector<32x128xf32>
      %48 = vector.extract_strided_slice %47 {offsets = [0, 0], sizes = [16, 128], strides = [1, 1]} : vector<32x128xf32> to vector<16x128xf32>
      %49 = arith.truncf %48 : vector<16x128xf32> to vector<16x128xbf16>
      %c0_26 = arith.constant 0 : index
      %c0_27 = arith.constant 0 : index
      %50 = vector.load %arg10[%c0_26, %c0_27] : memref<16x256xbf16, #tpu.memory_space<vmem>>, vector<16x128xbf16>
      tpu.vector_store %arg10[%c0_26, %c0_27], %49 {strides = array<i32>} : memref<16x256xbf16, #tpu.memory_space<vmem>>, vector<16x128xbf16>,
      %51 = vector.extract_strided_slice %47 {offsets = [16, 0], sizes = [16, 128], strides = [1, 1]} : vector<32x128xf32> to vector<16x128xf32>
      %52 = arith.truncf %51 : vector<16x128xf32> to vector<16x128xbf16>
      %c0_28 = arith.constant 0 : index
      %c128 = arith.constant 128 : index
      %53 = vector.load %arg10[%c0_28, %c128] : memref<16x256xbf16, #tpu.memory_space<vmem>>, vector<16x128xbf16>
      tpu.vector_store %arg10[%c0_28, %c128], %52 {strides = array<i32>} : memref<16x256xbf16, #tpu.memory_space<vmem>>, vector<16x128xbf16>,
    } else {
    }
    %c0 = arith.constant 0 : index
    %c0_1 = arith.constant 0 : index
    %3 = vector.load %arg8[%c0, %c0_1] : memref<32x16xbf16, #tpu.memory_space<vmem>>, vector<32x16xbf16>
    %c0_2 = arith.constant 0 : index
    %c0_3 = arith.constant 0 : index
    %4 = vector.load %arg10[%c0_2, %c0_3] : memref<16x256xbf16, #tpu.memory_space<vmem>>, vector<16x256xbf16>
    %cst = arith.constant dense<0.000000e+00> : vector<32x256xf32>
    %5 = tpu.matmul %3, %4, %cst {dimension_numbers = #tpu.dot_dimension_numbers<[1], [0], [0], [1], [0, 0, 1, 1], [], []>} : vector<32x16xbf16>, vector<16x256xbf16>, vector<32x256xf32> -> vector<32x256xf32>
    %6 = vector.extract_strided_slice %5 {offsets = [0, 0], sizes = [32, 128], strides = [1, 1]} : vector<32x256xf32> to vector<32x128xf32>
    %7 = vector.extract_strided_slice %5 {offsets = [0, 128], sizes = [32, 128], strides = [1, 1]} : vector<32x256xf32> to vector<32x128xf32>
    %c0_4 = arith.constant 0 : index
    %c0_5 = arith.constant 0 : index
    %c0_6 = arith.constant 0 : index
    %8 = vector.load %arg4[%c0_4, %c0_5, %c0_6] : memref<1x32x128xf32, #tpu.memory_space<vmem>>, vector<1x32x128xf32>
    %9 = vector.shape_cast %8 : vector<1x32x128xf32> to vector<32x128xf32>
    %10 = arith.mulf %6, %9 : vector<32x128xf32>
    %11 = arith.addf %10, %7 : vector<32x128xf32>
    %c0_7 = arith.constant 0 : index
    %c0_8 = arith.constant 0 : index
    %c0_9 = arith.constant 0 : index
    %12 = vector.load %arg9[%c0_7, %c0_8, %c0_9] : memref<1x32x128xf32, #tpu.memory_space<vmem>>, vector<1x32x128xf32>
    %13 = vector.shape_cast %12 : vector<1x32x128xf32> to vector<32x128xf32>
    %14 = vector.shape_cast %11 : vector<32x128xf32> to vector<1x32x128xf32>
    tpu.vector_store %arg9[%c0_7, %c0_8, %c0_9], %14 {strides = array<i32>} : memref<1x32x128xf32, #tpu.memory_space<vmem>>, vector<1x32x128xf32>,
    return
  }
  func.func @transform_0(%arg0: i32, %arg1: i32) -> (i32, i32, i32) {
    %c0_i32 = arith.constant 0 : i32
    %c0_i32_0 = arith.constant 0 : i32
    %c0_i32_1 = arith.constant 0 : i32
    return %arg0, %c0_i32, %c0_i32_0 : i32, i32, i32
  }
  func.func @transform_1(%arg0: i32, %arg1: i32) -> (i32, i32, i32) {
    %c0_i32 = arith.constant 0 : i32
    %c0_i32_0 = arith.constant 0 : i32
    %c0_i32_1 = arith.constant 0 : i32
    return %arg0, %c0_i32, %c0_i32_0 : i32, i32, i32
  }
  func.func @transform_2(%arg0: i32, %arg1: i32) -> (i32, i32, i32) {
    %c0_i32 = arith.constant 0 : i32
    %c0_i32_0 = arith.constant 0 : i32
    return %arg0, %arg1, %c0_i32 : i32, i32, i32
  }
  func.func @transform_3(%arg0: i32, %arg1: i32) -> (i32, i32) {
    %c0_i32 = arith.constant 0 : i32
    %c0_i32_0 = arith.constant 0 : i32
    %c0_i32_1 = arith.constant 0 : i32
    return %c0_i32, %c0_i32_0 : i32, i32
  }
  func.func @transform_4(%arg0: i32, %arg1: i32) -> (i32, i32) {
    %c0_i32 = arith.constant 0 : i32
    %c0_i32_0 = arith.constant 0 : i32
    %c0_i32_1 = arith.constant 0 : i32
    return %c0_i32, %c0_i32_0 : i32, i32
  }
  func.func @transform_5(%arg0: i32, %arg1: i32) -> (i32, i32) {
    %c0_i32 = arith.constant 0 : i32
    %c0_i32_0 = arith.constant 0 : i32
    %c0_i32_1 = arith.constant 0 : i32
    return %c0_i32, %c0_i32_0 : i32, i32
  }
  func.func @transform_6(%arg0: i32, %arg1: i32) -> (i32, i32) {
    %c0_i32 = arith.constant 0 : i32
    %c0_i32_0 = arith.constant 0 : i32
    return %arg1, %c0_i32 : i32, i32
  }
  func.func @transform_7(%arg0: i32, %arg1: i32) -> (i32, i32, i32) {
    %c0_i32 = arith.constant 0 : i32
    %c0_i32_0 = arith.constant 0 : i32
    return %arg0, %arg1, %c0_i32 : i32, i32, i32
  }
}

module attributes {stable_mosaic.version = 11 : i64} {
  func.func @_fgf_kernel(%arg0: i32, %arg1: i32, %arg2: memref<1x16x16xf32, #tpu.memory_space<vmem>>, %arg3: memref<1x16x16xf32, #tpu.memory_space<vmem>>, %arg4: memref<1x32x128xf32, #tpu.memory_space<vmem>>, %arg5: memref<16x16xf32, #tpu.memory_space<vmem>>, %arg6: memref<16x16xf32, #tpu.memory_space<vmem>>, %arg7: memref<16x128xbf16, #tpu.memory_space<vmem>>, %arg8: memref<32x16xbf16, #tpu.memory_space<vmem>>, %arg9: memref<1x32x128xf32, #tpu.memory_space<vmem>>, %arg10: memref<16x256xbf16, #tpu.memory_space<vmem>>) attributes {dimension_semantics = [#tpu.dimension_semantics<parallel>, #tpu.dimension_semantics<arbitrary>], iteration_bounds = array<i64: 8, 1>, scalar_prefetch = 0 : i64, scratch_operands = 1 : i64, tpu.core_type = #tpu.core_type<tc>, window_params = [{transform_indices = @transform_0, window_bounds = array<i64: 1, 16, 16>}, {transform_indices = @transform_1, window_bounds = array<i64: 1, 16, 16>}, {transform_indices = @transform_2, window_bounds = array<i64: 1, 32, 128>}, {pipeline_mode = #tpu.pipeline_mode<synchronous>, transform_indices = @transform_3, window_bounds = array<i64: 16, 16>}, {pipeline_mode = #tpu.pipeline_mode<synchronous>, transform_indices = @transform_4, window_bounds = array<i64: 16, 16>}, {pipeline_mode = #tpu.pipeline_mode<synchronous>, transform_indices = @transform_5, window_bounds = array<i64: 16, 128>}, {transform_indices = @transform_6, window_bounds = array<i64: 32, 16>}, {transform_indices = @transform_7, window_bounds = array<i64: 1, 32, 128>}]} {
    %c0_i32 = arith.constant 0 : i32
    %0 = arith.cmpi eq, %arg1, %c0_i32 : i32
    %1 = arith.extui %0 : i1 to i32
    %c0_i32_0 = arith.constant 0 : i32
    %2 = arith.cmpi ne, %1, %c0_i32_0 : i32
    scf.if %2 {
      %c0_10 = arith.constant 0 : index
      %c0_11 = arith.constant 0 : index
      %c0_12 = arith.constant 0 : index
      %15 = vector.load %arg2[%c0_10, %c0_11, %c0_12] : memref<1x16x16xf32, #tpu.memory_space<vmem>>, vector<1x16x16xf32>
      %16 = vector.shape_cast %15 : vector<1x16x16xf32> to vector<16x16xf32>
      %c0_13 = arith.constant 0 : index
      %c0_14 = arith.constant 0 : index
      %c0_15 = arith.constant 0 : index
      %17 = vector.load %arg3[%c0_13, %c0_14, %c0_15] : memref<1x16x16xf32, #tpu.memory_space<vmem>>, vector<1x16x16xf32>
      %18 = vector.shape_cast %17 : vector<1x16x16xf32> to vector<16x16xf32>
      %c0_16 = arith.constant 0 : index
      %c0_17 = arith.constant 0 : index
      %19 = vector.load %arg5[%c0_16, %c0_17] : memref<16x16xf32, #tpu.memory_space<vmem>>, vector<16x16xf32>
      %c0_18 = arith.constant 0 : index
      %c0_19 = arith.constant 0 : index
      %20 = vector.load %arg6[%c0_18, %c0_19] : memref<16x16xf32, #tpu.memory_space<vmem>>, vector<16x16xf32>
      %21 = arith.mulf %16, %18 : vector<16x16xf32>
      %22 = arith.mulf %16, %16 : vector<16x16xf32>
      %23 = tpu.concatenate %16, %18, %21, %22 in 1 : vector<16x16xf32>, vector<16x16xf32>, vector<16x16xf32>, vector<16x16xf32> -> vector<16x64xf32>
      %cst_20 = arith.constant dense<0.000000e+00> : vector<16x64xf32>
      %24 = tpu.matmul %19, %23, %cst_20 {dimension_numbers = #tpu.dot_dimension_numbers<[1], [0], [0], [1], [0, 0, 1, 1], [], []>} : vector<16x16xf32>, vector<16x64xf32>, vector<16x64xf32> -> vector<16x64xf32>
      %25 = vector.extract_strided_slice %24 {offsets = [0, 0], sizes = [16, 16], strides = [1, 1]} : vector<16x64xf32> to vector<16x16xf32>
      %26 = vector.extract_strided_slice %24 {offsets = [0, 16], sizes = [16, 16], strides = [1, 1]} : vector<16x64xf32> to vector<16x16xf32>
      %27 = vector.extract_strided_slice %24 {offsets = [0, 32], sizes = [16, 16], strides = [1, 1]} : vector<16x64xf32> to vector<16x16xf32>
      %28 = vector.extract_strided_slice %24 {offsets = [0, 48], sizes = [16, 16], strides = [1, 1]} : vector<16x64xf32> to vector<16x16xf32>
      %29 = tpu.concatenate %25, %26, %27, %28 in 0 : vector<16x16xf32>, vector<16x16xf32>, vector<16x16xf32>, vector<16x16xf32> -> vector<64x16xf32>
      %cst_21 = arith.constant dense<0.000000e+00> : vector<64x16xf32>
      %30 = tpu.matmul %29, %20, %cst_21 {dimension_numbers = #tpu.dot_dimension_numbers<[1], [0], [0], [1], [0, 0, 1, 1], [], []>} : vector<64x16xf32>, vector<16x16xf32>, vector<64x16xf32> -> vector<64x16xf32>
      %31 = vector.extract_strided_slice %30 {offsets = [0, 0], sizes = [16, 16], strides = [1, 1]} : vector<64x16xf32> to vector<16x16xf32>
      %32 = vector.extract_strided_slice %30 {offsets = [16, 0], sizes = [16, 16], strides = [1, 1]} : vector<64x16xf32> to vector<16x16xf32>
      %33 = vector.extract_strided_slice %30 {offsets = [32, 0], sizes = [16, 16], strides = [1, 1]} : vector<64x16xf32> to vector<16x16xf32>
      %34 = vector.extract_strided_slice %30 {offsets = [48, 0], sizes = [16, 16], strides = [1, 1]} : vector<64x16xf32> to vector<16x16xf32>
      %35 = arith.mulf %31, %32 : vector<16x16xf32>
      %36 = arith.subf %33, %35 : vector<16x16xf32>
      %37 = arith.mulf %31, %31 : vector<16x16xf32>
      %38 = arith.subf %34, %37 : vector<16x16xf32>
      %cst_22 = arith.constant 9.99999974E-6 : f32
      %39 = vector.broadcast %cst_22 : f32 to vector<16x16xf32>
      %40 = arith.addf %38, %39 : vector<16x16xf32>
      %41 = arith.divf %36, %40 : vector<16x16xf32>
      %42 = arith.mulf %41, %31 : vector<16x16xf32>
      %43 = arith.subf %32, %42 : vector<16x16xf32>
      %44 = tpu.concatenate %41, %43 in 0 : vector<16x16xf32>, vector<16x16xf32> -> vector<32x16xf32>
      %45 = arith.truncf %44 : vector<32x16xf32> to vector<32x16xbf16>
      %c0_23 = arith.constant 0 : index
      %c0_24 = arith.constant 0 : index
      %46 = vector.load %arg7[%c0_23, %c0_24] : memref<16x128xbf16, #tpu.memory_space<vmem>>, vector<16x128xbf16>
      %cst_25 = arith.constant dense<0.000000e+00> : vector<32x128xf32>
      %47 = tpu.matmul %45, %46, %cst_25 {dimension_numbers = #tpu.dot_dimension_numbers<[1], [0], [0], [1], [0, 0, 1, 1], [], []>} : vector<32x16xbf16>, vector<16x128xbf16>, vector<32x128xf32> -> vector<32x128xf32>
      %48 = vector.extract_strided_slice %47 {offsets = [0, 0], sizes = [16, 128], strides = [1, 1]} : vector<32x128xf32> to vector<16x128xf32>
      %49 = arith.truncf %48 : vector<16x128xf32> to vector<16x128xbf16>
      %c0_26 = arith.constant 0 : index
      %c0_27 = arith.constant 0 : index
      %50 = vector.load %arg10[%c0_26, %c0_27] : memref<16x256xbf16, #tpu.memory_space<vmem>>, vector<16x128xbf16>
      tpu.vector_store %arg10[%c0_26, %c0_27], %49 {strides = array<i32>} : memref<16x256xbf16, #tpu.memory_space<vmem>>, vector<16x128xbf16>,
      %51 = vector.extract_strided_slice %47 {offsets = [16, 0], sizes = [16, 128], strides = [1, 1]} : vector<32x128xf32> to vector<16x128xf32>
      %52 = arith.truncf %51 : vector<16x128xf32> to vector<16x128xbf16>
      %c0_28 = arith.constant 0 : index
      %c128 = arith.constant 128 : index
      %53 = vector.load %arg10[%c0_28, %c128] : memref<16x256xbf16, #tpu.memory_space<vmem>>, vector<16x128xbf16>
      tpu.vector_store %arg10[%c0_28, %c128], %52 {strides = array<i32>} : memref<16x256xbf16, #tpu.memory_space<vmem>>, vector<16x128xbf16>,
    } else {
    }
    %c0 = arith.constant 0 : index
    %c0_1 = arith.constant 0 : index
    %3 = vector.load %arg8[%c0, %c0_1] : memref<32x16xbf16, #tpu.memory_space<vmem>>, vector<32x16xbf16>
    %c0_2 = arith.constant 0 : index
    %c0_3 = arith.constant 0 : index
    %4 = vector.load %arg10[%c0_2, %c0_3] : memref<16x256xbf16, #tpu.memory_space<vmem>>, vector<16x256xbf16>
    %cst = arith.constant dense<0.000000e+00> : vector<32x256xf32>
    %5 = tpu.matmul %3, %4, %cst {dimension_numbers = #tpu.dot_dimension_numbers<[1], [0], [0], [1], [0, 0, 1, 1], [], []>} : vector<32x16xbf16>, vector<16x256xbf16>, vector<32x256xf32> -> vector<32x256xf32>
    %6 = vector.extract_strided_slice %5 {offsets = [0, 0], sizes = [32, 128], strides = [1, 1]} : vector<32x256xf32> to vector<32x128xf32>
    %7 = vector.extract_strided_slice %5 {offsets = [0, 128], sizes = [32, 128], strides = [1, 1]} : vector<32x256xf32> to vector<32x128xf32>
    %c0_4 = arith.constant 0 : index
    %c0_5 = arith.constant 0 : index
    %c0_6 = arith.constant 0 : index
    %8 = vector.load %arg4[%c0_4, %c0_5, %c0_6] : memref<1x32x128xf32, #tpu.memory_space<vmem>>, vector<1x32x128xf32>
    %9 = vector.shape_cast %8 : vector<1x32x128xf32> to vector<32x128xf32>
    %10 = arith.mulf %6, %9 : vector<32x128xf32>
    %11 = arith.addf %10, %7 : vector<32x128xf32>
    %c0_7 = arith.constant 0 : index
    %c0_8 = arith.constant 0 : index
    %c0_9 = arith.constant 0 : index
    %12 = vector.load %arg9[%c0_7, %c0_8, %c0_9] : memref<1x32x128xf32, #tpu.memory_space<vmem>>, vector<1x32x128xf32>
    %13 = vector.shape_cast %12 : vector<1x32x128xf32> to vector<32x128xf32>
    %14 = vector.shape_cast %11 : vector<32x128xf32> to vector<1x32x128xf32>
    tpu.vector_store %arg9[%c0_7, %c0_8, %c0_9], %14 {strides = array<i32>} : memref<1x32x128xf32, #tpu.memory_space<vmem>>, vector<1x32x128xf32>,
    return
  }
  func.func @transform_0(%arg0: i32, %arg1: i32) -> (i32, i32, i32) {
    %c0_i32 = arith.constant 0 : i32
    %c0_i32_0 = arith.constant 0 : i32
    %c0_i32_1 = arith.constant 0 : i32
    return %arg0, %c0_i32, %c0_i32_0 : i32, i32, i32
  }
  func.func @transform_1(%arg0: i32, %arg1: i32) -> (i32, i32, i32) {
    %c0_i32 = arith.constant 0 : i32
    %c0_i32_0 = arith.constant 0 : i32
    %c0_i32_1 = arith.constant 0 : i32
    return %arg0, %c0_i32, %c0_i32_0 : i32, i32, i32
  }
  func.func @transform_2(%arg0: i32, %arg1: i32) -> (i32, i32, i32) {
    %c0_i32 = arith.constant 0 : i32
    %c0_i32_0 = arith.constant 0 : i32
    return %arg0, %arg1, %c0_i32 : i32, i32, i32
  }
  func.func @transform_3(%arg0: i32, %arg1: i32) -> (i32, i32) {
    %c0_i32 = arith.constant 0 : i32
    %c0_i32_0 = arith.constant 0 : i32
    %c0_i32_1 = arith.constant 0 : i32
    return %c0_i32, %c0_i32_0 : i32, i32
  }
  func.func @transform_4(%arg0: i32, %arg1: i32) -> (i32, i32) {
    %c0_i32 = arith.constant 0 : i32
    %c0_i32_0 = arith.constant 0 : i32
    %c0_i32_1 = arith.constant 0 : i32
    return %c0_i32, %c0_i32_0 : i32, i32
  }
  func.func @transform_5(%arg0: i32, %arg1: i32) -> (i32, i32) {
    %c0_i32 = arith.constant 0 : i32
    %c0_i32_0 = arith.constant 0 : i32
    %c0_i32_1 = arith.constant 0 : i32
    return %c0_i32, %c0_i32_0 : i32, i32
  }
  func.func @transform_6(%arg0: i32, %arg1: i32) -> (i32, i32) {
    %c0_i32 = arith.constant 0 : i32
    %c0_i32_0 = arith.constant 0 : i32
    return %arg1, %c0_i32 : i32, i32
  }
  func.func @transform_7(%arg0: i32, %arg1: i32) -> (i32, i32, i32) {
    %c0_i32 = arith.constant 0 : i32
    %c0_i32_0 = arith.constant 0 : i32
    return %arg0, %arg1, %c0_i32 : i32, i32, i32
  }
}

</mosaic_0001>

<bundles_post_ra>
// kernel: tpu_custom_call.1
= control target key start
LH: loop header
LB: loop body
LE: loop exit
PB: predicated region body
PF: predicated region fallthrough
CT: control target
= control target key end

     0   :  { %s1634_s0 = inlined_call_operand.hbm [shape: f32[8,16,16], index: 0, kind: input, shape index: {}]   ;;  %s1635_s1 = inlined_call_operand.hbm [shape: f32[8,16,16], index: 1, kind: input, shape index: {}]   ;;  %s1636_s2 = inlined_call_operand.hbm [shape: f32[8,32,128], index: 2, kind: input, shape index: {}]   ;;  %s1637_s3 = inlined_call_operand.vmem [shape: f32[16,16], index: 3, kind: input, shape index: {}]   ;;  %s1638_s4 = inlined_call_operand.hbm [shape: f32[16,16], index: 4, kind: input, shape index: {}]   ;;  %s1639_s5 = inlined_call_operand.vmem [shape: bf16[16,128], index: 5, kind: input, shape index: {}]   ;;  %s1640_s6 = inlined_call_operand.vmem [shape: bf16[32,16], index: 6, kind: input, shape index: {}]   ;;  %s1641_s7 = inlined_call_operand.hbm [shape: f32[8,32,128], index: 7, kind: output, shape index: {}]  }
   0x1   :  { %1651 = sst [smem:[#allocation21_spill]] %s1634_s0 }
   0x2   :  { %1652 = sst [smem:[#allocation22_spill]] %s1635_s1 }
   0x3   :  { %1653 = sst [smem:[#allocation23_spill]] %s1638_s4 }
   0x4   :  { %12 = vsyncpa [#allocation4], 0 }
   0x5   :  { %14 = vsyncpa [#allocation4 + $0x1], 0 }
   0x6   :  { %15 = vsyncpa [#allocation7], 0 }
   0x7   :  { %17 = vsyncpa [#allocation7 + $0x1], 0 }
   0x8   :  { %18 = vsyncpa [#allocation10], 0 }
   0x9   :  { %19 = vsyncpa [#allocation5], 0 }
   0xa   :  { %21 = vsyncpa [#allocation5 + $0x1], 0  ;;  %s1397_s24 = smov 0   ;;  %s1399_s25 = smov 0  }
   0xb   :  { %s1401_s26 = smov 0   ;;  %s1403_s27 = smov 0  }
   0xc   :  { %s1405_s28 = smov 0   ;;  %s1407_s29 = smov 0  }
   0xd LB: > { %1654 = sst [smem:[#allocation16_spill]] %s1324_s24  ;;  %s39_s30 = sadd.s32 1, %s1340_s28  ;;  %s1344_s29 = sphi %s1407_s29, %s27_s29   ;;  %s1340_s28 = sphi %s1405_s28, %s1678_s28   ;;  %s1336_s27 = sphi %s1403_s27, %s1677_s27   ;;  %s1332_s26 = sphi %s1401_s26, %s1673_s26   ;;  %s1328_s25 = sphi %s1399_s25, %s1676_s25   ;;  %s1324_s24 = sphi %s1397_s24, %s1675_s24  }
   0xe   : > { %1655 = sst [smem:[#allocation17_spill]] %s1332_s26  ;;  %s46_s8 = sadd.s32 1, %s1332_s26 }
   0xf   : > { %p41_p0 = scmp.ge.s32.totalorder %s39_s30, 8  ;;  %p53_p1 = scmp.ne.s32.totalorder %s1332_s26, %s1328_s25 }
  0x10   : > { %p54_p2 = scmp.eq.s32.totalorder %s1344_s29, 0  ;;  %p1053_p5 = scmp.lt.s32.totalorder %s1344_s29, 8 }
  0x11   : > { %s1680_s30 = smov (%p41_p0, %s39_s30), 0  ;;  %s1441_s10 = sand.u32 1, %s1332_s26  }
  0x12   : > { %1656 = sst [smem:[#allocation18_spill]] %s1680_s30  ;;  %p55_p3 = por %p54_p2, %p53_p1 }
  0x13   : > { %s43_s9 = ssub.s32 %s1340_s28, %s1680_s30  ;;  %s998_s11 = sshll.u32 %s1340_s28, 4 }
  0x14   : > { %p44_p4 = scmp.eq.s32.totalorder %s43_s9, 0  ;;  %s1646_s13 = sshll.u32 %s1441_s10, 4 }
  0x15   : > { %p1448_p6 = pnand %p1053_p5, %p55_p3  ;;  %s305_s15 = sand.u32 1, %s1344_s29  }
  0x16   : > { %s1445_s12 = scalar_select %p44_p4, %s1332_s26, %s46_s8  }
  0x17   : > { %s1659_s1 = sld [smem:[#allocation22_spill]]  ;;  %s309_s19 = scalar_lea.vmem [#allocation6], %s1646_s13 }
  0x18   : > { %1657 = sst [smem:[#allocation19_spill]] %s1445_s12  ;;  %s317_s20 = sshll.u32 %s309_s19, 4  ;;  %s318_s20 = int_to_ptr.vmem [resolvable:$true] %s317_s20 }
  0x19   : > { %s1460_s22 = scalar_lea.sflag [#allocation7], %s305_s15  ;;  %s1642_s23 = smov 128  }
  0x1a   : > { %s1644_s8 = smov 8   ;;  %s1469_s9 = sadd.s32 4294967295, %s1344_s29  }
  0x1b   : > { %s937_s16 = sadd.s32 4294967294, %s1344_s29   ;;  %p59_p7 = scmp.ne.s32.totalorder %s1328_s25, %s1324_s24 }
  0x1c   : > { %p60_p8 = scmp.eq.s32.totalorder %s1469_s9, 0  ;;  %p228_p9 = scmp.eq.s32.totalorder %s1469_s9, 7 }
  0x1d   : > { %s314_s18 = scalar_lea.hbm %s1659_s1, %s998_s11  ;;  %p234_p10 = scmp.eq.s32.totalorder %s937_s16, 7 }
  0x1e   : > { %s315_s21 = sshll.u32 %s314_s18, 4  ;;  %p938_p11 = scmp.ge.s32.totalorder %s1344_s29, 1  ;;  %s316_s21 = int_to_ptr.hbm [resolvable:$true] %s315_s21 }
  0x1f   : > { %1044 = dma.hbm_to_vmem [thread:$0]  (!%p1448_p6), %s316_s21, 256, %s318_s20, %s1460_s22, %s1642_s23, %s1642_s23, %s1644_s8  }
  0x20   : > { %p1479_p12 = por %p60_p8, %p59_p7  ;;  %p1486_p13 = por %p228_p9, %p53_p1 }
  0x21   : > { %p1490_p0 = por %p234_p10, %p59_p7  ;;  %p241_p2 = scmp.lt.s32.totalorder %s1344_s29, 9 }
  0x22   : > { %s1664_s4 = sld [smem:[#allocation23_spill]]  ;;  %s1348_s23 = smov [#allocation9]  }
  0x23   : > { %s1662_s18 = scalar_select %p1490_p0, 1, 0 }
  0x24   : > { %p1498_p3 = pnand %p938_p11, %p241_p2  ;;  %s257_s8 = sshll.u32 %s1348_s23, 4  ;;  %s258_s8 = int_to_ptr.vmem [resolvable:$true] %s257_s8 }
  0x25   : > { %1663 = sst [smem:[#allocation20_spill]] %s1662_s18  ;;  %s1668_s26 = smov 8  }
  0x26   : > { %p1034_p1 = pneg %p1498_p3  ;;  %s1666_s0 = sld [smem:[#allocation21_spill]] }
  0x27   : > { %s1669_s18 = smov 128   ;;  %s948_s23 = sshll.u32 %s1441_s10, 5 }
  0x28   : > { %s255_s21 = sshll.u32 %s1664_s4, 4  ;;  %p1035_p4 = pnand %p1034_p1, %p60_p8  ;;  %s256_s21 = int_to_ptr.hbm [resolvable:$true] %s255_s21 }
  0x29   : > { %s1667_s4 = sshll.u32 %s1441_s10, 4  ;;  %s284_s24 = scalar_lea.sflag [#allocation4], %s1441_s10 }
  0x2a   : > { %s287_s30 = scalar_lea.vmem [#allocation3], %s1667_s4  ;;  %s331_s4 = scalar_lea.vmem [#allocation8], %s948_s23 }
  0x2b   : > { %s295_s12 = sshll.u32 %s287_s30, 4  ;;  %s341_s30 = sshll.u32 %s331_s4, 4  ;;  %s296_s12 = int_to_ptr.vmem [resolvable:$true] %s295_s12  ;;  %s342_s30 = int_to_ptr.vmem [resolvable:$true] %s341_s30 }
  0x2c   : > { %s292_s13 = scalar_lea.hbm %s1666_s0, %s998_s11  ;;  %s1000_s11 = sshll.u32 %s1340_s28, 5 }
  0x2d   : > { %s293_s1 = sshll.u32 %s292_s13, 4  ;;  %s338_s20 = scalar_lea.hbm %s1636_s2, %s1000_s11  ;;  %s294_s1 = int_to_ptr.hbm [resolvable:$true] %s293_s1 }
  0x2e   : > { %1037 = dma.hbm_to_vmem [thread:$0]  (!%p1035_p4), %s256_s21, 256, %s258_s8, [#allocation10], %s1669_s18, %s1669_s18, %s1668_s26  }
  0x2f   : > { %1041 = dma.hbm_to_vmem [thread:$0]  (!%p1448_p6), %s294_s1, 256, %s296_s12, %s284_s24, %s1669_s18, %s1669_s18, %s1668_s26  }
  0x30   : > { %s339_s0 = sshll.u32 %s338_s20, 4  ;;  %353 = sbr.rel (%p1498_p3) target bundleno = 934 (0x3a6), region = 48  ;;  %s340_s0 = int_to_ptr.hbm [resolvable:$true] %s339_s0 }
  0x31   : > { %1047 = dma.hbm_to_vmem [thread:$0]  (!%p1448_p6), %s340_s0, 512, %s342_s30, %s1460_s22, %s1669_s18, %s1669_s18, %s1668_s26  }
  0x32   : > { %s1536_s1 = sand.u32 (!%p1498_p3), 1, %s1328_s25  }
  0x33   : > { %s952_s24 = sshll.u32 (!%p1498_p3), %s1536_s1, 4  ;;  %s356_s10 = scalar_lea.sflag (!%p1498_p3), [#allocation4], %s1536_s1 }
  0x34   : > { %s359_s12 = scalar_lea.vmem (!%p1498_p3), [#allocation3], %s952_s24 }
  0x35   : > { %1307 = dma.done.wait (%p1479_p12), %s356_s10, 256  }
  0x36   : > { %1309 = vsyncadd (%p1479_p12), %s356_s10, 4294967040  ;;  %s365_s0 = sand.u32 1, %s1469_s9   ;;  %s369_s14 = scalar_lea.vmem [#allocation6], %s952_s24 }
  0x37   : > { %s366_s26 = scalar_lea.sflag [#allocation7], %s365_s0 }
  0x38   : > { %1311 = dma.done.wait (%p1479_p12), %s366_s26, 768  }
  0x39   : > { %1313 = vsyncadd (%p1479_p12), %s366_s26, 4294966528  ;;  %s954_s22 = sshll.u32 %s1536_s1, 5 }
  0x3a   : > { %s1552_s8 = scalar_lea.vmem [#allocation8], %s954_s22 }
  0x3b   : > { %1315 = dma.done.wait (%p60_p8), [#allocation10], 256  }
  0x3c   : > { %1317 = vsyncadd (%p60_p8), [#allocation10], 4294967040  ;;  %v446_v0 = vld [vmem:[%s369_s14] sm:$0xff]  ;;  %v447_v1 = vld [vmem:[%s369_s14 + $0x8] sm:$0xff]  ;;  %s1349_s15 = smov 16   ;;  %s1350_s18 = smov 48  }
  0x3d   : > { %v444_v2 = vld [vmem:[%s359_s12] sm:$0xff]  ;;  %v1115_v3 = vpack.i.bf16 %v446_v0, %v447_v1  ;;  %v445_v4 = vld [vmem:[%s359_s12 + $0x8] sm:$0xff]  ;;  %s1351_s21 = smov 32   ;;  %vm480_vm0 = vcmask 130048   ;;  %vm483_vm1 = vcmask 261120   ;;  %vm486_vm2 = vcmask 392192  }
  0x3e   : > { %v454_v5 = vmul.f32 %v444_v2, %v444_v2  ;;  %v455_v6 = vmul.f32 %v445_v4, %v445_v4  ;;  %v452_v7 = vmul.f32 %v446_v0, %v444_v2  ;;  %v453_v8 = vmul.f32 %v447_v1, %v445_v4  ;;  %v451_v11 = vld [vmem:[#allocation9 + $0x8] sm:$0xff]  ;;  %v448_v26 = vld [vmem:[%s1637_s3] sm:$0xff]  ;;  %v449_v27 = vld [vmem:[%s1637_s3 + $0x8] sm:$0xff]  ;;  %s1352_s13 = smov 80   ;;  %s1353_s19 = smov 112  }
  0x3f   : > { %1116 = vrot.lane.b32.xlu0 %v1115_v3, %s1349_s15  ;;  %562 = vmatpush.msra.mxu1 %v451_v11  ;;  %v450_v29 = vld [vmem:[#allocation9] sm:$0xff]  ;;  %s1354_s20 = smov 96   ;;  %v1001_v41 = vld [vmem:[%s1639_s5] sm:$0xff]  ;;  %s430_s26 = scalar_lea.vmem [#allocation11], %s954_s22 }
  0x40   : > { %v1125_v9 = vpack.i.bf16 %v454_v5, %v455_v6  ;;  %v1120_v10 = vpack.i.bf16 %v452_v7, %v453_v8  ;;  %1020 = vmatpush.msra.mxu2 %v451_v11  ;;  %s1006_s14 = sshll.u32 %s1336_s27, 5  ;;  %s778_s22 = sshll.u32 %s430_s26, 4  ;;  %s779_s22 = int_to_ptr.vmem [resolvable:$true] %s778_s22 }
  0x41   : > { %563 = vmatpush.msra.mxu1 %v450_v29  ;;  %s764_s16 = scalar_lea.sflag [#allocation5], %s1536_s1 }
  0x42   : > { %1126 = vrot.lane.b32.xlu1 %v1125_v9, %s1350_s18  ;;  %1021 = vmatpush.msra.mxu2 %v450_v29 }
  0x44   : > { %656 = vmatpush.bf16.msrb.mxu2 %v1001_v41  ;;  %v748_v41 = vld [vmem:[%s1552_s8 + $0x8] sm:$0xff] }
  0x47   : > { %1121 = vrot.lane.b32.xlu0 %v1120_v10, %s1351_s21  ;;  %s777_s21 = scalar_lea.hbm %s1641_s7, %s1006_s14 }
  0x48   : > { %s780_s9 = sshll.u32 %s777_s21, 4  ;;  %s781_s9 = int_to_ptr.hbm [resolvable:$true] %s780_s9 }
  0x49   : > { %s1268_s23 = sshra.s32 %s781_s9, 4  ;;  %s1269_s23 = int_to_ptr.hbm [resolvable:$true] %s1268_s23 }
  0x4a   : > { %s1270_s27 = scalar_lea.hbm %s1269_s23, 32  ;;  %p1275_p8 = scmp.lt.s32.totalorder %s1269_s23, %s1641_s7 }
  0x4b   : > { %p1271_p5 = scmp.ne.s32.totalorder %s1269_s23, %s1270_s27 }
  0x4d   : > { %p1272_p6 = pnand %p1271_p5, %p1486_p13 }
  0x4f   : > { %p1273_p7 = pneg %p1272_p6 }
  0xb1   : > { %v1117_v12 = vpop.permute.xlu0 %1116 }
  0xb2   : > { %v1119_v14 = vunpack.i.h.bf16 %v1117_v12  ;;  %v1118_v15 = vunpack.i.l.bf16 %v1117_v12 }
  0xb4   : > { %v1127_v13 = vpop.permute.xlu1 %1126  ;;  %v482_v21 = vsel %vm480_vm0, %v445_v4, %v1118_v15  ;;  %v481_v22 = vsel %vm480_vm0, %v444_v2, %v1119_v14 }
  0xb5   : > { %v1128_v17 = vunpack.i.l.bf16 %v1127_v13  ;;  %v1129_v20 = vunpack.i.h.bf16 %v1127_v13 }
  0xb9   : > { %v1122_v16 = vpop.permute.xlu0 %1121 }
  0xba   : > { %v1124_v18 = vunpack.i.h.bf16 %v1122_v16  ;;  %v1123_v19 = vunpack.i.l.bf16 %v1122_v16 }
  0xbc   : > { %v485_v23 = vsel %vm483_vm1, %v482_v21, %v1123_v19  ;;  %v484_v24 = vsel %vm483_vm1, %v481_v22, %v1124_v18 }
  0xbd   : > { %v488_v25 = vsel %vm486_vm2, %v485_v23, %v1128_v17  ;;  %v487_v28 = vsel %vm486_vm2, %v484_v24, %v1129_v20 }
  0xbe   : > { %509 = vmatpush.msra.mxu0 %v488_v25  ;;  %1018 = vmatpush.msra.mxu3 %v488_v25 }
  0xc0   : > { %510 = vmatpush.msra.mxu0 %v487_v28  ;;  %1019 = vmatpush.msra.mxu3 %v487_v28 }
  0xc1   : > { %957 = vmatmul.msk.f32.vlgmr.msra.gmra.mxu0 %vm480_vm0, %v448_v26  ;;  %958 = vmatmul.msk.f32.vlgmr.msra.gmra.mxu3 %vm480_vm0, %v449_v27 }
 0x13e   : > { %v512_v30 = vpop.f32.mrf.mxu0 }
 0x13f   : > { %528 = vrot.lane.b32.xlu1 %v512_v30, %s1352_s13  ;;  %959 = vmatmul.msk.f32.vlgmr.msra.gmra.mxu1 %vm480_vm0, %v512_v30 }
 0x144   : > { %v515_v31 = vpop.f32.mrf.mxu3 }
 0x145   : > { %522 = vrot.lane.b32.xlu0 %v515_v31, %s1353_s19  ;;  %530 = vrot.lane.b32.xlu2 %v515_v31, %s1352_s13 }
 0x147   : > { %524 = vrot.lane.b32.xlu1 %v512_v30, %s1354_s20  ;;  %960 = vmatmul.msk.f32.gmra.mxu1 %vm480_vm0, %v515_v31 }
 0x14d   : > { %520 = vrot.lane.b32.xlu2 %v512_v30, %s1353_s19 }
 0x155   : > { %526 = vrot.lane.b32.xlu2 %v515_v31, %s1354_s20 }
 0x19f   : > { %v531_v32 = vpop.permute.xlu2 %530 }
 0x1a7   : > { %v521_v33 = vpop.permute.xlu2 %520 }
 0x1a8   : > { %961 = vmatmul.msk.f32.gmra.mxu1 %vm480_vm0, %v521_v33  ;;  %v1002_v33 = vld [vmem:[%s1640_s6] sm:$0xff] }
 0x1af   : > { %v527_v37 = vpop.permute.xlu2 %526 }
 0x1b1   : > { %v529_v34 = vpop.permute.xlu1 %528 }
 0x1b2   : > { %965 = vmatmul.msk.f32.vlgmr.msra.gmra.mxu2 %vm480_vm0, %v529_v34  ;;  %v1003_v34 = vld [vmem:[%s1640_s6 + $0x8] sm:$0xff] }
 0x1b7   : > { %v523_v35 = vpop.permute.xlu0 %522 }
 0x1b8   : > { %962 = vmatmul.msk.f32.gmra.mxu1 %vm480_vm0, %v523_v35 }
 0x1b9   : > { %v525_v36 = vpop.permute.xlu1 %524 }
 0x1ba   : > { %966 = vmatmul.msk.f32.gmra.mxu2 %vm480_vm0, %v531_v32 }
 0x1bc   : > { %v565_v38 = vpop.f32.mrf.mxu1 }
 0x1bd   : > { %v593_v42 = vmul.f32 %v565_v38, %v565_v38 }
 0x1c0   : > { %963 = vmatmul.msk.f32.gmra.mxu1 %vm480_vm0, %v525_v36  ;;  %v747_v36 = vld [vmem:[%s1552_s8] sm:$0xff] }
 0x1c4   : > { %v568_v39 = vpop.f32.mrf.mxu1 }
 0x1c5   : > { %v594_v47 = vmul.f32 %v568_v39, %v568_v39 }
 0x1c8   : > { %964 = vmatmul.msk.f32.gmra.mxu1 %vm480_vm0, %v527_v37 }
 0x225   : > { %v571_v40 = vpop.f32.mrf.mxu1 }
 0x226   : > { %v589_v2 = vmul.f32 %v571_v40, %v565_v38 }
 0x235   : > { %v583_v43 = vpop.f32.mrf.mxu2  ;;  %v574_v46 = vpop.f32.mrf.mxu1 }
 0x236   : > { %v595_v44 = vsub.f32 %v583_v43, %v593_v42  ;;  %v590_v5 = vmul.f32 %v574_v46, %v568_v39 }
 0x238   : > { %v597_v45 = vadd.f32 1e-05, %v595_v44 }
 0x23a   : > { %1130 = vrcp.f32 %v597_v45  ;;  %v610_v59 = vand.u32 2147483648, %v597_v45  ;;  %vm604_vm4 = vweird.f32 %v597_v45  ;;  %v608_v60 = vand.u32 2147483647, %v597_v45 }
 0x23c   : > { %v611_v3 = vor.u32 1.1754944e-38, %v610_v59  ;;  %vm609_vm7 = vcmp.eq.f32.partialorder %v608_v60, 8.507059e+37 }
 0x23d   : > { %v586_v48 = vpop.f32.mrf.mxu2  ;;  %v577_v54 = vpop.f32.mrf.mxu1 }
 0x23e   : > { %v596_v49 = vsub.f32 %v586_v48, %v594_v47  ;;  %v591_v9 = vsub.f32 %v577_v54, %v589_v2 }
 0x240   : > { %v1131_v50 = vpop.eup %1130  ;;  %v598_v51 = vadd.f32 1e-05, %v596_v49 }
 0x241   : > { %v600_v52 = vmul.f32 %v1131_v50, %v597_v45  ;;  %vm605_vm3 = vweird.f32 %v1131_v50  ;;  %v749_v45 = vld [vmem:[%s1552_s8 + $0x10] sm:$0xff] }
 0x242   : > { %1132 = vrcp.f32 %v598_v51  ;;  %vm606_vm5 = vmor %vm604_vm4, %vm605_vm3  ;;  %v625_v62 = vand.u32 2147483648, %v598_v51  ;;  %v623_v1 = vand.u32 2147483647, %v598_v51  ;;  %vm619_vm8 = vweird.f32 %v598_v51 }
 0x243   : > { %v601_v53 = vsub.f32 1.0, %v600_v52 }
 0x244   : > { %v626_v8 = vor.u32 1.1754944e-38, %v625_v62  ;;  %vm624_vm10 = vcmp.eq.f32.partialorder %v623_v1, 8.507059e+37 }
 0x245   : > { %v602_v55 = vmul.f32 %v1131_v50, %v601_v53  ;;  %v580_v4 = vpop.f32.mrf.mxu1 }
 0x246   : > { %v592_v10 = vsub.f32 %v580_v4, %v590_v5 }
 0x247   : > { %v603_v57 = vadd.f32 %v1131_v50, %v602_v55 }
 0x248   : > { %v1133_v56 = vpop.eup %1132 }
 0x249   : > { %v615_v58 = vmul.f32 %v1133_v56, %v598_v51  ;;  %v607_v63 = vsel %vm606_vm5, %v1131_v50, %v603_v57  ;;  %vm620_vm6 = vweird.f32 %v1133_v56  ;;  %v750_v50 = vld [vmem:[%s1552_s8 + $0x18] sm:$0xff]  ;;  %s1274_s8 = scalar_lea.hbm %s1641_s7, 256 }
 0x24a   : > { %v612_v7 = vsel %vm609_vm7, %v611_v3, %v607_v63  ;;  %vm621_vm9 = vmor %vm619_vm8, %vm620_vm6  ;;  %p1276_p9 = scmp.lt.s32.totalorder %s1274_s8, %s1270_s27 }
 0x24b   : > { %v616_v61 = vsub.f32 1.0, %v615_v58  ;;  %v613_v13 = vmul.f32 %v612_v7, %v591_v9 }
 0x24c   : > { %p1277_p10 = por %p1276_p9, %p1275_p8 }
 0x24d   : > { %v617_v0 = vmul.f32 %v1133_v56, %v616_v61  ;;  %v629_v17 = vmul.f32 %v613_v13, %v565_v38 }
 0x24e   : > { %p1278_p11 = pnand %p1277_p10, %p1273_p7 }
 0x24f   : > { %v618_v6 = vadd.f32 %v1133_v56, %v617_v0  ;;  %v631_v19 = vsub.f32 %v571_v40, %v629_v17 }
 0x251   : > { %v622_v11 = vsel %vm621_vm9, %v1133_v56, %v618_v6 }
 0x252   : > { %v627_v12 = vsel %vm624_vm10, %v626_v8, %v622_v11 }
 0x253   : > { %v628_v14 = vmul.f32 %v627_v12, %v592_v10 }
 0x255   : > { %v633_v15 = vpack.c.bf16 %v628_v14, %v613_v13  ;;  %v630_v16 = vmul.f32 %v628_v14, %v568_v39 }
 0x257   : > { %971 = vmatmul.msk.bf16.vlgmr.msrb.gmra.mxu2 %vm480_vm0, %v633_v15  ;;  %v632_v18 = vsub.f32 %v574_v46, %v630_v16 }
 0x259   : > { %v634_v20 = vpack.c.bf16 %v632_v18, %v631_v19 }
 0x267   : > { %972 = vmatmul.msk.bf16.gmra.mxu2 %vm480_vm0, %v634_v20 }
 0x2da   : > { %v658_v21 = vpop.f32.mrf.mxu2 }
 0x2e2   : > { %v660_v22 = vpop.f32.mrf.mxu2 }
 0x2ea   : > { %v663_v23 = vpop.f32.mrf.mxu2 }
 0x2eb   : > { %v1010_v24 = vpack.c.bf16 %v663_v23, %v658_v21 }
 0x2ed   : > { %1011 = vst [vmem:[#allocation2] sm:$0xff] %v1010_v24  }
 0x2f2   : > { %v665_v25 = vpop.f32.mrf.mxu2 }
 0x2f3   : > { %v1015_v26 = vpack.c.bf16 %v665_v25, %v660_v22 }
 0x2f4   : > { %v983_v27 = vld [vmem:[#allocation2] sm:$0xf]  ;;  %v1004_v29 = vld [vmem:[#allocation2 + $0x4] sm:$0xf] }
 0x2f5   : > { %1017 = vst [vmem:[#allocation2 + $0x8] sm:$0xff] %v1015_v26  }
 0x2fc   : > { %v1005_v28 = vld [vmem:[#allocation2 + $0x4] sm:$0xf0]  ;;  %v985_v30 = vld [vmem:[#allocation2 + $0x8] sm:$0xf0] }
 0x2fd   : > { %v984_v31 = vor.u32 %v1005_v28, %v983_v27  ;;  %v988_v32 = vor.u32 %v1004_v29, %v985_v30 }
 0x2ff   : > { %716 = vmatpush.bf16.msrb.mxu3 %v984_v31  ;;  %735 = vmatpush.bf16.msrb.mxu0 %v988_v32 }
 0x302   : > { %989 = vmatmul.msk.bf16.vlgmr.msrb.gmra.mxu3 %vm480_vm0, %v1002_v33  ;;  %991 = vmatmul.msk.bf16.vlgmr.msrb.gmra.mxu0 %vm480_vm0, %v1002_v33 }
 0x312   : > { %990 = vmatmul.msk.bf16.gmra.mxu3 %vm480_vm0, %v1003_v34  ;;  %992 = vmatmul.msk.bf16.gmra.mxu0 %vm480_vm0, %v1003_v34 }
 0x37f   : > { %v737_v35 = vpop.f32.mrf.mxu0 }
 0x385   : > { %v718_v37 = vpop.f32.mrf.mxu3 }
 0x386   : > { %v751_v38 = vmul.f32 %v747_v36, %v718_v37 }
 0x387   : > { %v739_v40 = vpop.f32.mrf.mxu0 }
 0x388   : > { %v755_v39 = vadd.f32 %v751_v38, %v737_v35 }
 0x38a   : > { %759 = vst [vmem:[%s430_s26] sm:$0xff] %v755_v39 }
 0x38d   : > { %v720_v42 = vpop.f32.mrf.mxu3 }
 0x38e   : > { %v752_v43 = vmul.f32 %v748_v41, %v720_v42 }
 0x38f   : > { %v742_v46 = vpop.f32.mrf.mxu0 }
 0x390   : > { %v756_v44 = vadd.f32 %v752_v43, %v739_v40 }
 0x392   : > { %760 = vst [vmem:[%s430_s26 + $0x8] sm:$0xff] %v756_v44 }
 0x395   : > { %v723_v47 = vpop.f32.mrf.mxu3 }
 0x396   : > { %v753_v48 = vmul.f32 %v749_v45, %v723_v47 }
 0x397   : > { %v744_v53 = vpop.f32.mrf.mxu0 }
 0x398   : > { %v757_v49 = vadd.f32 %v753_v48, %v742_v46 }
 0x39a   : > { %761 = vst [vmem:[%s430_s26 + $0x10] sm:$0xff] %v757_v49 }
 0x39d   : > { %v725_v51 = vpop.f32.mrf.mxu3 }
 0x39e   : > { %v754_v52 = vmul.f32 %v750_v50, %v725_v51 }
 0x3a0   : > { %v758_v54 = vadd.f32 %v754_v52, %v744_v53 }
 0x3a2   : > { %762 = vst [vmem:[%s430_s26 + $0x18] sm:$0xff] %v758_v54 }
 0x3a3   : > { %1281 = shalt.err (!%p1278_p11)
}
 0x3a4   : > { %s1355_s1 = smov 128   ;;  %s1356_s4 = smov 8  }
 0x3a5   : > { %1032 = dma.vmem_to_hbm [thread:$0]  (%p1486_p13), %s779_s22, 512, %s781_s9, %s764_s16, %s1355_s1, %s1355_s1, %s1356_s4  }
 0x3a6 PF: > { %s1670_s30 = sld [smem:[#allocation16_spill]]  ;;  %p1055_p12 = scmp.ge.s32.totalorder %s1344_s29, 2 }
 0x3a8   : > { %p1049_p2 = pnand %p1055_p12, %p1490_p0 }
 0x3aa   : > { %p1050_p3 = pneg %p1049_p2 }
 0x3ac   : > { %s795_s10 = sand.u32 1, %s1670_s30  }
 0x3ad   : > { %s796_s12 = scalar_lea.sflag [#allocation5], %s795_s10 }
 0x3ae   : > { %1319 = dma.done.wait (%p1050_p3), %s796_s12, 512  }
 0x3af   : > { %1321 = vsyncadd (%p1050_p3), %s796_s12, 4294966784  ;;  %s27_s29 = sadd.s32 1, %s1344_s29   ;;  %s1672_s0 = sld [smem:[#allocation17_spill]] }
 0x3b0   : > { %p24_p1 = scmp.ge.s32.totalorder %s27_s29, 10   ;;  %s1673_s26 = sld [smem:[#allocation19_spill]] }
 0x3b1   : > { %s1674_s17 = sld [smem:[#allocation18_spill]]  ;;  %s1675_s24 = smov %s1328_s25 }
 0x3b2   : > { %s1677_s27 = smov %s1340_s28 }
 0x3b3   :  { %26 = sbr.rel (!%p24_p1) target bundleno = 13 (0xd), region = 128 }
 0x3b5   : > { %s1676_s25 = smov %s1672_s0 }
 0x3b7   : > { %s1678_s28 = smov %s1674_s17 }
 0x3b8   :  { %802 = vsyncpa [#allocation4], 1 }
 0x3b9   :  { %804 = vsyncpa [#allocation4 + $0x1], 1 }
 0x3ba   :  { %805 = vsyncpa [#allocation7], 1 }
 0x3bb   :  { %807 = vsyncpa [#allocation7 + $0x1], 1 }
 0x3bc   :  { %808 = vsyncpa [#allocation10], 1 }
 0x3bd   :  { %809 = vsyncpa [#allocation5], 1 }
 0x3be   :  { %811 = vsyncpa [#allocation5 + $0x1], 1 }

// kernel: tpu_custom_call.1
= control target key start
LH: loop header
LB: loop body
LE: loop exit
PB: predicated region body
PF: predicated region fallthrough
CT: control target
= control target key end

     0   :  { %s1634_s0 = inlined_call_operand.hbm [shape: f32[8,16,16], index: 0, kind: input, shape index: {}]   ;;  %s1635_s1 = inlined_call_operand.hbm [shape: f32[8,16,16], index: 1, kind: input, shape index: {}]   ;;  %s1636_s2 = inlined_call_operand.hbm [shape: f32[8,32,128], index: 2, kind: input, shape index: {}]   ;;  %s1637_s3 = inlined_call_operand.vmem [shape: f32[16,16], index: 3, kind: input, shape index: {}]   ;;  %s1638_s4 = inlined_call_operand.hbm [shape: f32[16,16], index: 4, kind: input, shape index: {}]   ;;  %s1639_s5 = inlined_call_operand.vmem [shape: bf16[16,128], index: 5, kind: input, shape index: {}]   ;;  %s1640_s6 = inlined_call_operand.vmem [shape: bf16[32,16], index: 6, kind: input, shape index: {}]   ;;  %s1641_s7 = inlined_call_operand.hbm [shape: f32[8,32,128], index: 7, kind: output, shape index: {}]  }
   0x1   :  { %1651 = sst [smem:[#allocation21_spill]] %s1634_s0 }
   0x2   :  { %1652 = sst [smem:[#allocation22_spill]] %s1635_s1 }
   0x3   :  { %1653 = sst [smem:[#allocation23_spill]] %s1638_s4 }
   0x4   :  { %12 = vsyncpa [#allocation4], 0 }
   0x5   :  { %14 = vsyncpa [#allocation4 + $0x1], 0 }
   0x6   :  { %15 = vsyncpa [#allocation7], 0 }
   0x7   :  { %17 = vsyncpa [#allocation7 + $0x1], 0 }
   0x8   :  { %18 = vsyncpa [#allocation10], 0 }
   0x9   :  { %19 = vsyncpa [#allocation5], 0 }
   0xa   :  { %21 = vsyncpa [#allocation5 + $0x1], 0  ;;  %s1397_s24 = smov 0   ;;  %s1399_s25 = smov 0  }
   0xb   :  { %s1401_s26 = smov 0   ;;  %s1403_s27 = smov 0  }
   0xc   :  { %s1405_s28 = smov 0   ;;  %s1407_s29 = smov 0  }
   0xd LB: > { %1654 = sst [smem:[#allocation16_spill]] %s1324_s24  ;;  %s39_s30 = sadd.s32 1, %s1340_s28  ;;  %s1344_s29 = sphi %s1407_s29, %s27_s29   ;;  %s1340_s28 = sphi %s1405_s28, %s1678_s28   ;;  %s1336_s27 = sphi %s1403_s27, %s1677_s27   ;;  %s1332_s26 = sphi %s1401_s26, %s1673_s26   ;;  %s1328_s25 = sphi %s1399_s25, %s1676_s25   ;;  %s1324_s24 = sphi %s1397_s24, %s1675_s24  }
   0xe   : > { %1655 = sst [smem:[#allocation17_spill]] %s1332_s26  ;;  %s46_s8 = sadd.s32 1, %s1332_s26 }
   0xf   : > { %p41_p0 = scmp.ge.s32.totalorder %s39_s30, 8  ;;  %p53_p1 = scmp.ne.s32.totalorder %s1332_s26, %s1328_s25 }
  0x10   : > { %p54_p2 = scmp.eq.s32.totalorder %s1344_s29, 0  ;;  %p1053_p5 = scmp.lt.s32.totalorder %s1344_s29, 8 }
  0x11   : > { %s1680_s30 = smov (%p41_p0, %s39_s30), 0  ;;  %s1441_s10 = sand.u32 1, %s1332_s26  }
  0x12   : > { %1656 = sst [smem:[#allocation18_spill]] %s1680_s30  ;;  %p55_p3 = por %p54_p2, %p53_p1 }
  0x13   : > { %s43_s9 = ssub.s32 %s1340_s28, %s1680_s30  ;;  %s998_s11 = sshll.u32 %s1340_s28, 4 }
  0x14   : > { %p44_p4 = scmp.eq.s32.totalorder %s43_s9, 0  ;;  %s1646_s13 = sshll.u32 %s1441_s10, 4 }
  0x15   : > { %p1448_p6 = pnand %p1053_p5, %p55_p3  ;;  %s305_s15 = sand.u32 1, %s1344_s29  }
  0x16   : > { %s1445_s12 = scalar_select %p44_p4, %s1332_s26, %s46_s8  }
  0x17   : > { %s1659_s1 = sld [smem:[#allocation22_spill]]  ;;  %s309_s19 = scalar_lea.vmem [#allocation6], %s1646_s13 }
  0x18   : > { %1657 = sst [smem:[#allocation19_spill]] %s1445_s12  ;;  %s317_s20 = sshll.u32 %s309_s19, 4  ;;  %s318_s20 = int_to_ptr.vmem [resolvable:$true] %s317_s20 }
  0x19   : > { %s1460_s22 = scalar_lea.sflag [#allocation7], %s305_s15  ;;  %s1642_s23 = smov 128  }
  0x1a   : > { %s1644_s8 = smov 8   ;;  %s1469_s9 = sadd.s32 4294967295, %s1344_s29  }
  0x1b   : > { %s937_s16 = sadd.s32 4294967294, %s1344_s29   ;;  %p59_p7 = scmp.ne.s32.totalorder %s1328_s25, %s1324_s24 }
  0x1c   : > { %p60_p8 = scmp.eq.s32.totalorder %s1469_s9, 0  ;;  %p228_p9 = scmp.eq.s32.totalorder %s1469_s9, 7 }
  0x1d   : > { %s314_s18 = scalar_lea.hbm %s1659_s1, %s998_s11  ;;  %p234_p10 = scmp.eq.s32.totalorder %s937_s16, 7 }
  0x1e   : > { %s315_s21 = sshll.u32 %s314_s18, 4  ;;  %p938_p11 = scmp.ge.s32.totalorder %s1344_s29, 1  ;;  %s316_s21 = int_to_ptr.hbm [resolvable:$true] %s315_s21 }
  0x1f   : > { %1044 = dma.hbm_to_vmem [thread:$0]  (!%p1448_p6), %s316_s21, 256, %s318_s20, %s1460_s22, %s1642_s23, %s1642_s23, %s1644_s8  }
  0x20   : > { %p1479_p12 = por %p60_p8, %p59_p7  ;;  %p1486_p13 = por %p228_p9, %p53_p1 }
  0x21   : > { %p1490_p0 = por %p234_p10, %p59_p7  ;;  %p241_p2 = scmp.lt.s32.totalorder %s1344_s29, 9 }
  0x22   : > { %s1664_s4 = sld [smem:[#allocation23_spill]]  ;;  %s1348_s23 = smov [#allocation9]  }
  0x23   : > { %s1662_s18 = scalar_select %p1490_p0, 1, 0 }
  0x24   : > { %p1498_p3 = pnand %p938_p11, %p241_p2  ;;  %s257_s8 = sshll.u32 %s1348_s23, 4  ;;  %s258_s8 = int_to_ptr.vmem [resolvable:$true] %s257_s8 }
  0x25   : > { %1663 = sst [smem:[#allocation20_spill]] %s1662_s18  ;;  %s1668_s26 = smov 8  }
  0x26   : > { %p1034_p1 = pneg %p1498_p3  ;;  %s1666_s0 = sld [smem:[#allocation21_spill]] }
  0x27   : > { %s1669_s18 = smov 128   ;;  %s948_s23 = sshll.u32 %s1441_s10, 5 }
  0x28   : > { %s255_s21 = sshll.u32 %s1664_s4, 4  ;;  %p1035_p4 = pnand %p1034_p1, %p60_p8  ;;  %s256_s21 = int_to_ptr.hbm [resolvable:$true] %s255_s21 }
  0x29   : > { %s1667_s4 = sshll.u32 %s1441_s10, 4  ;;  %s284_s24 = scalar_lea.sflag [#allocation4], %s1441_s10 }
  0x2a   : > { %s287_s30 = scalar_lea.vmem [#allocation3], %s1667_s4  ;;  %s331_s4 = scalar_lea.vmem [#allocation8], %s948_s23 }
  0x2b   : > { %s295_s12 = sshll.u32 %s287_s30, 4  ;;  %s341_s30 = sshll.u32 %s331_s4, 4  ;;  %s296_s12 = int_to_ptr.vmem [resolvable:$true] %s295_s12  ;;  %s342_s30 = int_to_ptr.vmem [resolvable:$true] %s341_s30 }
  0x2c   : > { %s292_s13 = scalar_lea.hbm %s1666_s0, %s998_s11  ;;  %s1000_s11 = sshll.u32 %s1340_s28, 5 }
  0x2d   : > { %s293_s1 = sshll.u32 %s292_s13, 4  ;;  %s338_s20 = scalar_lea.hbm %s1636_s2, %s1000_s11  ;;  %s294_s1 = int_to_ptr.hbm [resolvable:$true] %s293_s1 }
  0x2e   : > { %1037 = dma.hbm_to_vmem [thread:$0]  (!%p1035_p4), %s256_s21, 256, %s258_s8, [#allocation10], %s1669_s18, %s1669_s18, %s1668_s26  }
  0x2f   : > { %1041 = dma.hbm_to_vmem [thread:$0]  (!%p1448_p6), %s294_s1, 256, %s296_s12, %s284_s24, %s1669_s18, %s1669_s18, %s1668_s26  }
  0x30   : > { %s339_s0 = sshll.u32 %s338_s20, 4  ;;  %353 = sbr.rel (%p1498_p3) target bundleno = 934 (0x3a6), region = 48  ;;  %s340_s0 = int_to_ptr.hbm [resolvable:$true] %s339_s0 }
  0x31   : > { %1047 = dma.hbm_to_vmem [thread:$0]  (!%p1448_p6), %s340_s0, 512, %s342_s30, %s1460_s22, %s1669_s18, %s1669_s18, %s1668_s26  }
  0x32   : > { %s1536_s1 = sand.u32 (!%p1498_p3), 1, %s1328_s25  }
  0x33   : > { %s952_s24 = sshll.u32 (!%p1498_p3), %s1536_s1, 4  ;;  %s356_s10 = scalar_lea.sflag (!%p1498_p3), [#allocation4], %s1536_s1 }
  0x34   : > { %s359_s12 = scalar_lea.vmem (!%p1498_p3), [#allocation3], %s952_s24 }
  0x35   : > { %1307 = dma.done.wait (%p1479_p12), %s356_s10, 256  }
  0x36   : > { %1309 = vsyncadd (%p1479_p12), %s356_s10, 4294967040  ;;  %s365_s0 = sand.u32 1, %s1469_s9   ;;  %s369_s14 = scalar_lea.vmem [#allocation6], %s952_s24 }
  0x37   : > { %s366_s26 = scalar_lea.sflag [#allocation7], %s365_s0 }
  0x38   : > { %1311 = dma.done.wait (%p1479_p12), %s366_s26, 768  }
  0x39   : > { %1313 = vsyncadd (%p1479_p12), %s366_s26, 4294966528  ;;  %s954_s22 = sshll.u32 %s1536_s1, 5 }
  0x3a   : > { %s1552_s8 = scalar_lea.vmem [#allocation8], %s954_s22 }
  0x3b   : > { %1315 = dma.done.wait (%p60_p8), [#allocation10], 256  }
  0x3c   : > { %1317 = vsyncadd (%p60_p8), [#allocation10], 4294967040  ;;  %v446_v0 = vld [vmem:[%s369_s14] sm:$0xff]  ;;  %v447_v1 = vld [vmem:[%s369_s14 + $0x8] sm:$0xff]  ;;  %s1349_s15 = smov 16   ;;  %s1350_s18 = smov 48  }
  0x3d   : > { %v444_v2 = vld [vmem:[%s359_s12] sm:$0xff]  ;;  %v1115_v3 = vpack.i.bf16 %v446_v0, %v447_v1  ;;  %v445_v4 = vld [vmem:[%s359_s12 + $0x8] sm:$0xff]  ;;  %s1351_s21 = smov 32   ;;  %vm480_vm0 = vcmask 130048   ;;  %vm483_vm1 = vcmask 261120   ;;  %vm486_vm2 = vcmask 392192  }
  0x3e   : > { %v454_v5 = vmul.f32 %v444_v2, %v444_v2  ;;  %v455_v6 = vmul.f32 %v445_v4, %v445_v4  ;;  %v452_v7 = vmul.f32 %v446_v0, %v444_v2  ;;  %v453_v8 = vmul.f32 %v447_v1, %v445_v4  ;;  %v451_v11 = vld [vmem:[#allocation9 + $0x8] sm:$0xff]  ;;  %v448_v26 = vld [vmem:[%s1637_s3] sm:$0xff]  ;;  %v449_v27 = vld [vmem:[%s1637_s3 + $0x8] sm:$0xff]  ;;  %s1352_s13 = smov 80   ;;  %s1353_s19 = smov 112  }
  0x3f   : > { %1116 = vrot.lane.b32.xlu0 %v1115_v3, %s1349_s15  ;;  %562 = vmatpush.msra.mxu1 %v451_v11  ;;  %v450_v29 = vld [vmem:[#allocation9] sm:$0xff]  ;;  %s1354_s20 = smov 96   ;;  %v1001_v41 = vld [vmem:[%s1639_s5] sm:$0xff]  ;;  %s430_s26 = scalar_lea.vmem [#allocation11], %s954_s22 }
  0x40   : > { %v1125_v9 = vpack.i.bf16 %v454_v5, %v455_v6  ;;  %v1120_v10 = vpack.i.bf16 %v452_v7, %v453_v8  ;;  %1020 = vmatpush.msra.mxu2 %v451_v11  ;;  %s1006_s14 = sshll.u32 %s1336_s27, 5  ;;  %s778_s22 = sshll.u32 %s430_s26, 4  ;;  %s779_s22 = int_to_ptr.vmem [resolvable:$true] %s778_s22 }
  0x41   : > { %563 = vmatpush.msra.mxu1 %v450_v29  ;;  %s764_s16 = scalar_lea.sflag [#allocation5], %s1536_s1 }
  0x42   : > { %1126 = vrot.lane.b32.xlu1 %v1125_v9, %s1350_s18  ;;  %1021 = vmatpush.msra.mxu2 %v450_v29 }
  0x44   : > { %656 = vmatpush.bf16.msrb.mxu2 %v1001_v41  ;;  %v748_v41 = vld [vmem:[%s1552_s8 + $0x8] sm:$0xff] }
  0x47   : > { %1121 = vrot.lane.b32.xlu0 %v1120_v10, %s1351_s21  ;;  %s777_s21 = scalar_lea.hbm %s1641_s7, %s1006_s14 }
  0x48   : > { %s780_s9 = sshll.u32 %s777_s21, 4  ;;  %s781_s9 = int_to_ptr.hbm [resolvable:$true] %s780_s9 }
  0x49   : > { %s1268_s23 = sshra.s32 %s781_s9, 4  ;;  %s1269_s23 = int_to_ptr.hbm [resolvable:$true] %s1268_s23 }
  0x4a   : > { %s1270_s27 = scalar_lea.hbm %s1269_s23, 32  ;;  %p1275_p8 = scmp.lt.s32.totalorder %s1269_s23, %s1641_s7 }
  0x4b   : > { %p1271_p5 = scmp.ne.s32.totalorder %s1269_s23, %s1270_s27 }
  0x4d   : > { %p1272_p6 = pnand %p1271_p5, %p1486_p13 }
  0x4f   : > { %p1273_p7 = pneg %p1272_p6 }
  0xb1   : > { %v1117_v12 = vpop.permute.xlu0 %1116 }
  0xb2   : > { %v1119_v14 = vunpack.i.h.bf16 %v1117_v12  ;;  %v1118_v15 = vunpack.i.l.bf16 %v1117_v12 }
  0xb4   : > { %v1127_v13 = vpop.permute.xlu1 %1126  ;;  %v482_v21 = vsel %vm480_vm0, %v445_v4, %v1118_v15  ;;  %v481_v22 = vsel %vm480_vm0, %v444_v2, %v1119_v14 }
  0xb5   : > { %v1128_v17 = vunpack.i.l.bf16 %v1127_v13  ;;  %v1129_v20 = vunpack.i.h.bf16 %v1127_v13 }
  0xb9   : > { %v1122_v16 = vpop.permute.xlu0 %1121 }
  0xba   : > { %v1124_v18 = vunpack.i.h.bf16 %v1122_v16  ;;  %v1123_v19 = vunpack.i.l.bf16 %v1122_v16 }
  0xbc   : > { %v485_v23 = vsel %vm483_vm1, %v482_v21, %v1123_v19  ;;  %v484_v24 = vsel %vm483_vm1, %v481_v22, %v1124_v18 }
  0xbd   : > { %v488_v25 = vsel %vm486_vm2, %v485_v23, %v1128_v17  ;;  %v487_v28 = vsel %vm486_vm2, %v484_v24, %v1129_v20 }
  0xbe   : > { %509 = vmatpush.msra.mxu0 %v488_v25  ;;  %1018 = vmatpush.msra.mxu3 %v488_v25 }
  0xc0   : > { %510 = vmatpush.msra.mxu0 %v487_v28  ;;  %1019 = vmatpush.msra.mxu3 %v487_v28 }
  0xc1   : > { %957 = vmatmul.msk.f32.vlgmr.msra.gmra.mxu0 %vm480_vm0, %v448_v26  ;;  %958 = vmatmul.msk.f32.vlgmr.msra.gmra.mxu3 %vm480_vm0, %v449_v27 }
 0x13e   : > { %v512_v30 = vpop.f32.mrf.mxu0 }
 0x13f   : > { %528 = vrot.lane.b32.xlu1 %v512_v30, %s1352_s13  ;;  %959 = vmatmul.msk.f32.vlgmr.msra.gmra.mxu1 %vm480_vm0, %v512_v30 }
 0x144   : > { %v515_v31 = vpop.f32.mrf.mxu3 }
 0x145   : > { %522 = vrot.lane.b32.xlu0 %v515_v31, %s1353_s19  ;;  %530 = vrot.lane.b32.xlu2 %v515_v31, %s1352_s13 }
 0x147   : > { %524 = vrot.lane.b32.xlu1 %v512_v30, %s1354_s20  ;;  %960 = vmatmul.msk.f32.gmra.mxu1 %vm480_vm0, %v515_v31 }
 0x14d   : > { %520 = vrot.lane.b32.xlu2 %v512_v30, %s1353_s19 }
 0x155   : > { %526 = vrot.lane.b32.xlu2 %v515_v31, %s1354_s20 }
 0x19f   : > { %v531_v32 = vpop.permute.xlu2 %530 }
 0x1a7   : > { %v521_v33 = vpop.permute.xlu2 %520 }
 0x1a8   : > { %961 = vmatmul.msk.f32.gmra.mxu1 %vm480_vm0, %v521_v33  ;;  %v1002_v33 = vld [vmem:[%s1640_s6] sm:$0xff] }
 0x1af   : > { %v527_v37 = vpop.permute.xlu2 %526 }
 0x1b1   : > { %v529_v34 = vpop.permute.xlu1 %528 }
 0x1b2   : > { %965 = vmatmul.msk.f32.vlgmr.msra.gmra.mxu2 %vm480_vm0, %v529_v34  ;;  %v1003_v34 = vld [vmem:[%s1640_s6 + $0x8] sm:$0xff] }
 0x1b7   : > { %v523_v35 = vpop.permute.xlu0 %522 }
 0x1b8   : > { %962 = vmatmul.msk.f32.gmra.mxu1 %vm480_vm0, %v523_v35 }
 0x1b9   : > { %v525_v36 = vpop.permute.xlu1 %524 }
 0x1ba   : > { %966 = vmatmul.msk.f32.gmra.mxu2 %vm480_vm0, %v531_v32 }
 0x1bc   : > { %v565_v38 = vpop.f32.mrf.mxu1 }
 0x1bd   : > { %v593_v42 = vmul.f32 %v565_v38, %v565_v38 }
 0x1c0   : > { %963 = vmatmul.msk.f32.gmra.mxu1 %vm480_vm0, %v525_v36  ;;  %v747_v36 = vld [vmem:[%s1552_s8] sm:$0xff] }
 0x1c4   : > { %v568_v39 = vpop.f32.mrf.mxu1 }
 0x1c5   : > { %v594_v47 = vmul.f32 %v568_v39, %v568_v39 }
 0x1c8   : > { %964 = vmatmul.msk.f32.gmra.mxu1 %vm480_vm0, %v527_v37 }
 0x225   : > { %v571_v40 = vpop.f32.mrf.mxu1 }
 0x226   : > { %v589_v2 = vmul.f32 %v571_v40, %v565_v38 }
 0x235   : > { %v583_v43 = vpop.f32.mrf.mxu2  ;;  %v574_v46 = vpop.f32.mrf.mxu1 }
 0x236   : > { %v595_v44 = vsub.f32 %v583_v43, %v593_v42  ;;  %v590_v5 = vmul.f32 %v574_v46, %v568_v39 }
 0x238   : > { %v597_v45 = vadd.f32 1e-05, %v595_v44 }
 0x23a   : > { %1130 = vrcp.f32 %v597_v45  ;;  %v610_v59 = vand.u32 2147483648, %v597_v45  ;;  %vm604_vm4 = vweird.f32 %v597_v45  ;;  %v608_v60 = vand.u32 2147483647, %v597_v45 }
 0x23c   : > { %v611_v3 = vor.u32 1.1754944e-38, %v610_v59  ;;  %vm609_vm7 = vcmp.eq.f32.partialorder %v608_v60, 8.507059e+37 }
 0x23d   : > { %v586_v48 = vpop.f32.mrf.mxu2  ;;  %v577_v54 = vpop.f32.mrf.mxu1 }
 0x23e   : > { %v596_v49 = vsub.f32 %v586_v48, %v594_v47  ;;  %v591_v9 = vsub.f32 %v577_v54, %v589_v2 }
 0x240   : > { %v1131_v50 = vpop.eup %1130  ;;  %v598_v51 = vadd.f32 1e-05, %v596_v49 }
 0x241   : > { %v600_v52 = vmul.f32 %v1131_v50, %v597_v45  ;;  %vm605_vm3 = vweird.f32 %v1131_v50  ;;  %v749_v45 = vld [vmem:[%s1552_s8 + $0x10] sm:$0xff] }
 0x242   : > { %1132 = vrcp.f32 %v598_v51  ;;  %vm606_vm5 = vmor %vm604_vm4, %vm605_vm3  ;;  %v625_v62 = vand.u32 2147483648, %v598_v51  ;;  %v623_v1 = vand.u32 2147483647, %v598_v51  ;;  %vm619_vm8 = vweird.f32 %v598_v51 }
 0x243   : > { %v601_v53 = vsub.f32 1.0, %v600_v52 }
 0x244   : > { %v626_v8 = vor.u32 1.1754944e-38, %v625_v62  ;;  %vm624_vm10 = vcmp.eq.f32.partialorder %v623_v1, 8.507059e+37 }
 0x245   : > { %v602_v55 = vmul.f32 %v1131_v50, %v601_v53  ;;  %v580_v4 = vpop.f32.mrf.mxu1 }
 0x246   : > { %v592_v10 = vsub.f32 %v580_v4, %v590_v5 }
 0x247   : > { %v603_v57 = vadd.f32 %v1131_v50, %v602_v55 }
 0x248   : > { %v1133_v56 = vpop.eup %1132 }
 0x249   : > { %v615_v58 = vmul.f32 %v1133_v56, %v598_v51  ;;  %v607_v63 = vsel %vm606_vm5, %v1131_v50, %v603_v57  ;;  %vm620_vm6 = vweird.f32 %v1133_v56  ;;  %v750_v50 = vld [vmem:[%s1552_s8 + $0x18] sm:$0xff]  ;;  %s1274_s8 = scalar_lea.hbm %s1641_s7, 256 }
 0x24a   : > { %v612_v7 = vsel %vm609_vm7, %v611_v3, %v607_v63  ;;  %vm621_vm9 = vmor %vm619_vm8, %vm620_vm6  ;;  %p1276_p9 = scmp.lt.s32.totalorder %s1274_s8, %s1270_s27 }
 0x24b   : > { %v616_v61 = vsub.f32 1.0, %v615_v58  ;;  %v613_v13 = vmul.f32 %v612_v7, %v591_v9 }
 0x24c   : > { %p1277_p10 = por %p1276_p9, %p1275_p8 }
 0x24d   : > { %v617_v0 = vmul.f32 %v1133_v56, %v616_v61  ;;  %v629_v17 = vmul.f32 %v613_v13, %v565_v38 }
 0x24e   : > { %p1278_p11 = pnand %p1277_p10, %p1273_p7 }
 0x24f   : > { %v618_v6 = vadd.f32 %v1133_v56, %v617_v0  ;;  %v631_v19 = vsub.f32 %v571_v40, %v629_v17 }
 0x251   : > { %v622_v11 = vsel %vm621_vm9, %v1133_v56, %v618_v6 }
 0x252   : > { %v627_v12 = vsel %vm624_vm10, %v626_v8, %v622_v11 }
 0x253   : > { %v628_v14 = vmul.f32 %v627_v12, %v592_v10 }
 0x255   : > { %v633_v15 = vpack.c.bf16 %v628_v14, %v613_v13  ;;  %v630_v16 = vmul.f32 %v628_v14, %v568_v39 }
 0x257   : > { %971 = vmatmul.msk.bf16.vlgmr.msrb.gmra.mxu2 %vm480_vm0, %v633_v15  ;;  %v632_v18 = vsub.f32 %v574_v46, %v630_v16 }
 0x259   : > { %v634_v20 = vpack.c.bf16 %v632_v18, %v631_v19 }
 0x267   : > { %972 = vmatmul.msk.bf16.gmra.mxu2 %vm480_vm0, %v634_v20 }
 0x2da   : > { %v658_v21 = vpop.f32.mrf.mxu2 }
 0x2e2   : > { %v660_v22 = vpop.f32.mrf.mxu2 }
 0x2ea   : > { %v663_v23 = vpop.f32.mrf.mxu2 }
 0x2eb   : > { %v1010_v24 = vpack.c.bf16 %v663_v23, %v658_v21 }
 0x2ed   : > { %1011 = vst [vmem:[#allocation2] sm:$0xff] %v1010_v24  }
 0x2f2   : > { %v665_v25 = vpop.f32.mrf.mxu2 }
 0x2f3   : > { %v1015_v26 = vpack.c.bf16 %v665_v25, %v660_v22 }
 0x2f4   : > { %v983_v27 = vld [vmem:[#allocation2] sm:$0xf]  ;;  %v1004_v29 = vld [vmem:[#allocation2 + $0x4] sm:$0xf] }
 0x2f5   : > { %1017 = vst [vmem:[#allocation2 + $0x8] sm:$0xff] %v1015_v26  }
 0x2fc   : > { %v1005_v28 = vld [vmem:[#allocation2 + $0x4] sm:$0xf0]  ;;  %v985_v30 = vld [vmem:[#allocation2 + $0x8] sm:$0xf0] }
 0x2fd   : > { %v984_v31 = vor.u32 %v1005_v28, %v983_v27  ;;  %v988_v32 = vor.u32 %v1004_v29, %v985_v30 }
 0x2ff   : > { %716 = vmatpush.bf16.msrb.mxu3 %v984_v31  ;;  %735 = vmatpush.bf16.msrb.mxu0 %v988_v32 }
 0x302   : > { %989 = vmatmul.msk.bf16.vlgmr.msrb.gmra.mxu3 %vm480_vm0, %v1002_v33  ;;  %991 = vmatmul.msk.bf16.vlgmr.msrb.gmra.mxu0 %vm480_vm0, %v1002_v33 }
 0x312   : > { %990 = vmatmul.msk.bf16.gmra.mxu3 %vm480_vm0, %v1003_v34  ;;  %992 = vmatmul.msk.bf16.gmra.mxu0 %vm480_vm0, %v1003_v34 }
 0x37f   : > { %v737_v35 = vpop.f32.mrf.mxu0 }
 0x385   : > { %v718_v37 = vpop.f32.mrf.mxu3 }
 0x386   : > { %v751_v38 = vmul.f32 %v747_v36, %v718_v37 }
 0x387   : > { %v739_v40 = vpop.f32.mrf.mxu0 }
 0x388   : > { %v755_v39 = vadd.f32 %v751_v38, %v737_v35 }
 0x38a   : > { %759 = vst [vmem:[%s430_s26] sm:$0xff] %v755_v39 }
 0x38d   : > { %v720_v42 = vpop.f32.mrf.mxu3 }
 0x38e   : > { %v752_v43 = vmul.f32 %v748_v41, %v720_v42 }
 0x38f   : > { %v742_v46 = vpop.f32.mrf.mxu0 }
 0x390   : > { %v756_v44 = vadd.f32 %v752_v43, %v739_v40 }
 0x392   : > { %760 = vst [vmem:[%s430_s26 + $0x8] sm:$0xff] %v756_v44 }
 0x395   : > { %v723_v47 = vpop.f32.mrf.mxu3 }
 0x396   : > { %v753_v48 = vmul.f32 %v749_v45, %v723_v47 }
 0x397   : > { %v744_v53 = vpop.f32.mrf.mxu0 }
 0x398   : > { %v757_v49 = vadd.f32 %v753_v48, %v742_v46 }
 0x39a   : > { %761 = vst [vmem:[%s430_s26 + $0x10] sm:$0xff] %v757_v49 }
 0x39d   : > { %v725_v51 = vpop.f32.mrf.mxu3 }
 0x39e   : > { %v754_v52 = vmul.f32 %v750_v50, %v725_v51 }
 0x3a0   : > { %v758_v54 = vadd.f32 %v754_v52, %v744_v53 }
 0x3a2   : > { %762 = vst [vmem:[%s430_s26 + $0x18] sm:$0xff] %v758_v54 }
 0x3a3   : > { %1281 = shalt.err (!%p1278_p11)
}
 0x3a4   : > { %s1355_s1 = smov 128   ;;  %s1356_s4 = smov 8  }
 0x3a5   : > { %1032 = dma.vmem_to_hbm [thread:$0]  (%p1486_p13), %s779_s22, 512, %s781_s9, %s764_s16, %s1355_s1, %s1355_s1, %s1356_s4  }
 0x3a6 PF: > { %s1670_s30 = sld [smem:[#allocation16_spill]]  ;;  %p1055_p12 = scmp.ge.s32.totalorder %s1344_s29, 2 }
 0x3a8   : > { %p1049_p2 = pnand %p1055_p12, %p1490_p0 }
 0x3aa   : > { %p1050_p3 = pneg %p1049_p2 }
 0x3ac   : > { %s795_s10 = sand.u32 1, %s1670_s30  }
 0x3ad   : > { %s796_s12 = scalar_lea.sflag [#allocation5], %s795_s10 }
 0x3ae   : > { %1319 = dma.done.wait (%p1050_p3), %s796_s12, 512  }
 0x3af   : > { %1321 = vsyncadd (%p1050_p3), %s796_s12, 4294966784  ;;  %s27_s29 = sadd.s32 1, %s1344_s29   ;;  %s1672_s0 = sld [smem:[#allocation17_spill]] }
 0x3b0   : > { %p24_p1 = scmp.ge.s32.totalorder %s27_s29, 10   ;;  %s1673_s26 = sld [smem:[#allocation19_spill]] }
 0x3b1   : > { %s1674_s17 = sld [smem:[#allocation18_spill]]  ;;  %s1675_s24 = smov %s1328_s25 }
 0x3b2   : > { %s1677_s27 = smov %s1340_s28 }
 0x3b3   :  { %26 = sbr.rel (!%p24_p1) target bundleno = 13 (0xd), region = 128 }
 0x3b5   : > { %s1676_s25 = smov %s1672_s0 }
 0x3b7   : > { %s1678_s28 = smov %s1674_s17 }
 0x3b8   :  { %802 = vsyncpa [#allocation4], 1 }
 0x3b9   :  { %804 = vsyncpa [#allocation4 + $0x1], 1 }
 0x3ba   :  { %805 = vsyncpa [#allocation7], 1 }
 0x3bb   :  { %807 = vsyncpa [#allocation7 + $0x1], 1 }
 0x3bc   :  { %808 = vsyncpa [#allocation10], 1 }
 0x3bd   :  { %809 = vsyncpa [#allocation5], 1 }
 0x3be   :  { %811 = vsyncpa [#allocation5 + $0x1], 1 }

</bundles_post_ra>
